<compile_context>
chip_gen: v5e
topology: v5e:2x2
jax: 0.10.0
libtpu: 0.0.40
codegen_flags: <defaults>
</compile_context>

<pallas_src>
import jax
import jax.numpy as jnp
import numpy as np
from jax import lax
from jax.experimental import pallas as pl
from jax.experimental.pallas import tpu as pltpu

VOCAB = 32     # vocab_size
EMB = 16       # embedding_dims
HID = 75       # LSTM hidden size (fixed by the module)
HP = 128       # lane-padded hidden size used inside the kernel
LIN1 = 128     # linear1 out features (fixed by the module)
SEQ = 8        # example sequence length


def _fused_lstm_kernel(tok_ref, emb_ref, wih_ref, whh_ref, b_ref,
                       w1_ref, b1_ref, w2_ref, b2_ref, out_ref):
    """Whole forward in one kernel invocation.

    tok_ref : (S, 1)  int32 token ids
    emb_ref : (V, E)  embedding table
    wih_ref : (E, 4*HP)  fused input->gate weights, gate order [i, f, o, g]
    whh_ref : (HP, 4*HP) fused hidden->gate weights (rows >= HID are zero)
    b_ref   : (1, 4*HP)  combined bias (b_ih + b_hh), zero in padded lanes
    w1_ref  : (HP, 128)  (rows >= HID are zero), b1_ref: (1, 128)
    w2_ref  : (128, V),  b2_ref: (1, V)
    out_ref : (1, V)     log-softmax output
    """
    S = tok_ref.shape[0]
    V = emb_ref.shape[0]

    # --- in-kernel embedding lookup as a one-hot MXU matmul (no XLA gather) ---
    tok = tok_ref[...]                                              # (S, 1) int32
    iota = lax.broadcasted_iota(jnp.int32, (S, V), 1)               # (S, V)
    one_hot = (iota == tok).astype(jnp.float32)                     # (S, V)
    x_emb = jnp.dot(one_hot, emb_ref[...],
                    preferred_element_type=jnp.float32)             # (S, E)

    # --- hoisted input projection for all timesteps (+ combined bias) ---
    x_proj = jnp.dot(x_emb, wih_ref[...],
                     preferred_element_type=jnp.float32) + b_ref[...]   # (S, 4*HP)

    whh = whh_ref[...]                                              # (HP, 4*HP)

    h = jnp.zeros((1, HP), jnp.float32)
    c = jnp.zeros((1, HP), jnp.float32)

    # --- fully unrolled serial recurrence: one MXU matmul per step -----------
    # packed gate layout: [ i | f | o | g ], each slab is HP=128 lanes wide.
    for t in range(S):
        gates = x_proj[t:t + 1, :] + jnp.dot(
            h, whh, preferred_element_type=jnp.float32)             # (1, 4*HP)
        sig = jax.nn.sigmoid(gates[:, :3 * HP])                     # i, f, o
        g = jnp.tanh(gates[:, 3 * HP:])                             # g
        i = sig[:, 0:HP]
        f = sig[:, HP:2 * HP]
        o = sig[:, 2 * HP:3 * HP]
        c = f * c + i * g
        h = o * jnp.tanh(c)
    # padded lanes (>= HID) of h/c stay exactly 0:
    #   gate preact = 0 -> c_pad = 0.5*c_pad + 0.5*tanh(0) = 0, h_pad = 0.5*tanh(0) = 0

    # --- head: linear1 + relu, linear2, log_softmax --------------------------
    y = jnp.dot(h, w1_ref[...], preferred_element_type=jnp.float32) + b1_ref[...]
    y = jnp.maximum(y, 0.0)
    logits = jnp.dot(y, w2_ref[...], preferred_element_type=jnp.float32) + b2_ref[...]
    m = jnp.max(logits, axis=-1, keepdims=True)
    shifted = logits - m
    lse = jnp.log(jnp.sum(jnp.exp(shifted), axis=-1, keepdims=True))
    out_ref[...] = shifted - lse


def generate_model2_forward(tokens, packed):
    tok2d = tokens.reshape(-1, 1).astype(jnp.int32)                 # (S, 1)
    args = (tok2d, packed["emb"], packed["wih"], packed["whh"], packed["b"],
            packed["w1"], packed["b1"], packed["w2"], packed["b2"])

    vmem = pl.BlockSpec(memory_space=pltpu.MemorySpace.VMEM)
    return pl.pallas_call(
        _fused_lstm_kernel,
        out_shape=jax.ShapeDtypeStruct((1, VOCAB), jnp.float32),
        in_specs=[vmem] * len(args),
        out_specs=vmem,
    )(*args)


def init_params(key):
    """PyTorch-shaped random params (raw) + fused lane-padded kernel params (packed)."""
    ks = jax.random.split(key, 9)
    k_lstm = 1.0 / np.sqrt(HID)

    embedding = jax.random.normal(ks[0], (VOCAB, EMB), jnp.float32)
    w_ih = jax.random.uniform(ks[1], (4 * HID, EMB), jnp.float32, -k_lstm, k_lstm)
    w_hh = jax.random.uniform(ks[2], (4 * HID, HID), jnp.float32, -k_lstm, k_lstm)
    b_ih = jax.random.uniform(ks[3], (4 * HID,), jnp.float32, -k_lstm, k_lstm)
    b_hh = jax.random.uniform(ks[4], (4 * HID,), jnp.float32, -k_lstm, k_lstm)

    k1 = 1.0 / np.sqrt(HID)      # torch Linear(75,128) init bound
    w1 = jax.random.uniform(ks[5], (LIN1, HID), jnp.float32, -k1, k1)
    b1 = jax.random.uniform(ks[6], (LIN1,), jnp.float32, -k1, k1)
    k2 = 1.0 / np.sqrt(LIN1)     # torch Linear(128,vocab) init bound
    w2 = jax.random.uniform(ks[7], (VOCAB, LIN1), jnp.float32, -k2, k2)
    b2 = jax.random.uniform(ks[8], (VOCAB,), jnp.float32, -k2, k2)

    raw = dict(embedding=embedding, w_ih=w_ih, w_hh=w_hh, b_ih=b_ih, b_hh=b_hh,
               w1=w1, b1=b1, w2=w2, b2=b2)

    # ---- pack into fused, lane-padded kernel layout ----
    # torch packs gates as [i, f, g, o]; kernel slab order is [i, f, o, g].
    gate_order = (0, 1, 3, 2)            # torch gate index per packed slot
    wih_np = np.asarray(w_ih)
    whh_np = np.asarray(w_hh)
    bsum_np = np.asarray(b_ih + b_hh)

    wih_f = np.zeros((EMB, 4 * HP), np.float32)
    whh_f = np.zeros((HP, 4 * HP), np.float32)
    b_f = np.zeros((1, 4 * HP), np.float32)
    for s, gt in enumerate(gate_order):
        rows = slice(gt * HID, (gt + 1) * HID)
        cols = slice(s * HP, s * HP + HID)
        wih_f[:, cols] = wih_np[rows, :].T
        whh_f[:HID, cols] = whh_np[rows, :].T
        b_f[0, cols] = bsum_np[rows]

    w1_f = np.zeros((HP, LIN1), np.float32)
    w1_f[:HID, :] = np.asarray(w1).T
    b1_f = np.asarray(b1).reshape(1, LIN1)
    w2_f = np.asarray(w2).T                       # (128, V)
    b2_f = np.asarray(b2).reshape(1, VOCAB)

    packed = dict(emb=embedding,
                  wih=jnp.asarray(wih_f), whh=jnp.asarray(whh_f), b=jnp.asarray(b_f),
                  w1=jnp.asarray(w1_f), b1=jnp.asarray(b1_f),
                  w2=jnp.asarray(w2_f), b2=jnp.asarray(b2_f))
    return raw, packed


def ref_forward(tokens, raw):
    """Pure-JAX reference mirroring the PyTorch forward (torch weight layout)."""
    x = raw["embedding"][tokens].astype(jnp.float32)                # (S, E)
    h = jnp.zeros((1, HID), jnp.float32)
    c = jnp.zeros((1, HID), jnp.float32)
    b = (raw["b_ih"] + raw["b_hh"]).reshape(1, 4 * HID)
    for t in range(int(tokens.shape[0])):
        gates = x[t:t + 1] @ raw["w_ih"].T + h @ raw["w_hh"].T + b  # (1, 4H)
        i = jax.nn.sigmoid(gates[:, 0 * HID:1 * HID])
        f = jax.nn.sigmoid(gates[:, 1 * HID:2 * HID])
        g = jnp.tanh(gates[:, 2 * HID:3 * HID])
        o = jax.nn.sigmoid(gates[:, 3 * HID:4 * HID])
        c = f * c + i * g
        h = o * jnp.tanh(c)
    y = jnp.maximum(h @ raw["w1"].T + raw["b1"], 0.0)
    logits = y @ raw["w2"].T + raw["b2"]
    return jax.nn.log_softmax(logits, axis=1)


if __name__ == "__main__":
    key = jax.random.PRNGKey(0)
    k_tok, k_par = jax.random.split(key)
    tokens = jax.random.randint(k_tok, (SEQ,), 0, VOCAB, dtype=jnp.int32)
    raw, packed = init_params(k_par)

    out = generate_model2_forward(tokens, packed)
    out = jax.block_until_ready(out)

    ref = ref_forward(tokens, raw)
    assert out.shape == (1, VOCAB)
    np.testing.assert_allclose(np.asarray(out), np.asarray(ref), rtol=2e-3, atol=2e-3)
    print("KERNEL_OK")
</pallas_src>

<mosaic_0001>
module attributes {stable_mosaic.version = 11 : i64} {
  func.func @_fused_lstm_kernel(%arg0: memref<8x1xi32, #tpu.memory_space<vmem>>, %arg1: memref<32x16xf32, #tpu.memory_space<vmem>>, %arg2: memref<16x512xf32, #tpu.memory_space<vmem>>, %arg3: memref<128x512xf32, #tpu.memory_space<vmem>>, %arg4: memref<1x512xf32, #tpu.memory_space<vmem>>, %arg5: memref<128x128xf32, #tpu.memory_space<vmem>>, %arg6: memref<1x128xf32, #tpu.memory_space<vmem>>, %arg7: memref<128x32xf32, #tpu.memory_space<vmem>>, %arg8: memref<1x32xf32, #tpu.memory_space<vmem>>, %arg9: memref<1x32xf32, #tpu.memory_space<vmem>>) attributes {dimension_semantics = [], scalar_prefetch = 0 : i64, scratch_operands = 0 : i64, tpu.core_type = #tpu.core_type<tc>} {
    %c0 = arith.constant 0 : index
    %c0_0 = arith.constant 0 : index
    %0 = vector.load %arg0[%c0, %c0_0] : memref<8x1xi32, #tpu.memory_space<vmem>>, vector<8x1xi32>
    %1 = tpu.iota {dimensions = array<i32: 1>} : vector<8x32xi32>
    %2 = vector.broadcast %0 : vector<8x1xi32> to vector<8x32xi32>
    %3 = arith.cmpi eq, %1, %2 : vector<8x32xi32>
    %4 = arith.extui %3 : vector<8x32xi1> to vector<8x32xi32>
    %5 = arith.sitofp %4 : vector<8x32xi32> to vector<8x32xf32>
    %c0_1 = arith.constant 0 : index
    %c0_2 = arith.constant 0 : index
    %6 = vector.load %arg1[%c0_1, %c0_2] : memref<32x16xf32, #tpu.memory_space<vmem>>, vector<32x16xf32>
    %cst = arith.constant dense<0.000000e+00> : vector<8x16xf32>
    %7 = tpu.matmul %5, %6, %cst {dimension_numbers = #tpu.dot_dimension_numbers<[1], [0], [0], [1], [0, 0, 1, 1], [], []>} : vector<8x32xf32>, vector<32x16xf32>, vector<8x16xf32> -> vector<8x16xf32>
    %c0_3 = arith.constant 0 : index
    %c0_4 = arith.constant 0 : index
    %8 = vector.load %arg2[%c0_3, %c0_4] : memref<16x512xf32, #tpu.memory_space<vmem>>, vector<16x512xf32>
    %cst_5 = arith.constant dense<0.000000e+00> : vector<8x512xf32>
    %9 = tpu.matmul %7, %8, %cst_5 {dimension_numbers = #tpu.dot_dimension_numbers<[1], [0], [0], [1], [0, 0, 1, 1], [], []>} : vector<8x16xf32>, vector<16x512xf32>, vector<8x512xf32> -> vector<8x512xf32>
    %c0_6 = arith.constant 0 : index
    %c0_7 = arith.constant 0 : index
    %10 = vector.load %arg4[%c0_6, %c0_7] : memref<1x512xf32, #tpu.memory_space<vmem>>, vector<1x512xf32>
    %11 = vector.broadcast %10 : vector<1x512xf32> to vector<8x512xf32>
    %12 = arith.addf %9, %11 : vector<8x512xf32>
    %c0_8 = arith.constant 0 : index
    %c0_9 = arith.constant 0 : index
    %13 = vector.load %arg3[%c0_8, %c0_9] : memref<128x512xf32, #tpu.memory_space<vmem>>, vector<128x512xf32>
    %cst_10 = arith.constant 0.000000e+00 : f32
    %14 = vector.broadcast %cst_10 : f32 to vector<1x128xf32>
    %cst_11 = arith.constant 0.000000e+00 : f32
    %15 = vector.broadcast %cst_11 : f32 to vector<1x128xf32>
    %16 = vector.extract_strided_slice %12 {offsets = [0, 0], sizes = [1, 512], strides = [1, 1]} : vector<8x512xf32> to vector<1x512xf32>
    %cst_12 = arith.constant dense<0.000000e+00> : vector<1x512xf32>
    %17 = tpu.matmul %14, %13, %cst_12 {dimension_numbers = #tpu.dot_dimension_numbers<[1], [0], [0], [1], [0, 0, 1, 1], [], []>} : vector<1x128xf32>, vector<128x512xf32>, vector<1x512xf32> -> vector<1x512xf32>
    %18 = arith.addf %16, %17 : vector<1x512xf32>
    %19 = vector.extract_strided_slice %18 {offsets = [0, 0], sizes = [1, 384], strides = [1, 1]} : vector<1x512xf32> to vector<1x384xf32>
    %20 = arith.negf %19 : vector<1x384xf32>
    %21 = math.exp %20 : vector<1x384xf32>
    %cst_13 = arith.constant 1.000000e+00 : f32
    %22 = vector.broadcast %cst_13 : f32 to vector<1x384xf32>
    %23 = arith.addf %22, %21 : vector<1x384xf32>
    %24 = arith.divf %22, %23 : vector<1x384xf32>
    %25 = vector.extract_strided_slice %18 {offsets = [0, 384], sizes = [1, 128], strides = [1, 1]} : vector<1x512xf32> to vector<1x128xf32>
    %26 = math.tanh %25 : vector<1x128xf32>
    %27 = vector.extract_strided_slice %24 {offsets = [0, 0], sizes = [1, 128], strides = [1, 1]} : vector<1x384xf32> to vector<1x128xf32>
    %28 = vector.extract_strided_slice %24 {offsets = [0, 128], sizes = [1, 128], strides = [1, 1]} : vector<1x384xf32> to vector<1x128xf32>
    %29 = vector.extract_strided_slice %24 {offsets = [0, 256], sizes = [1, 128], strides = [1, 1]} : vector<1x384xf32> to vector<1x128xf32>
    %30 = arith.mulf %28, %15 : vector<1x128xf32>
    %31 = arith.mulf %27, %26 : vector<1x128xf32>
    %32 = arith.addf %30, %31 : vector<1x128xf32>
    %33 = math.tanh %32 : vector<1x128xf32>
    %34 = arith.mulf %29, %33 : vector<1x128xf32>
    %35 = vector.extract_strided_slice %12 {offsets = [1, 0], sizes = [1, 512], strides = [1, 1]} : vector<8x512xf32> to vector<1x512xf32>
    %cst_14 = arith.constant dense<0.000000e+00> : vector<1x512xf32>
    %36 = tpu.matmul %34, %13, %cst_14 {dimension_numbers = #tpu.dot_dimension_numbers<[1], [0], [0], [1], [0, 0, 1, 1], [], []>} : vector<1x128xf32>, vector<128x512xf32>, vector<1x512xf32> -> vector<1x512xf32>
    %37 = arith.addf %35, %36 : vector<1x512xf32>
    %38 = vector.extract_strided_slice %37 {offsets = [0, 0], sizes = [1, 384], strides = [1, 1]} : vector<1x512xf32> to vector<1x384xf32>
    %39 = arith.negf %38 : vector<1x384xf32>
    %40 = math.exp %39 : vector<1x384xf32>
    %cst_15 = arith.constant 1.000000e+00 : f32
    %41 = vector.broadcast %cst_15 : f32 to vector<1x384xf32>
    %42 = arith.addf %41, %40 : vector<1x384xf32>
    %43 = arith.divf %41, %42 : vector<1x384xf32>
    %44 = vector.extract_strided_slice %37 {offsets = [0, 384], sizes = [1, 128], strides = [1, 1]} : vector<1x512xf32> to vector<1x128xf32>
    %45 = math.tanh %44 : vector<1x128xf32>
    %46 = vector.extract_strided_slice %43 {offsets = [0, 0], sizes = [1, 128], strides = [1, 1]} : vector<1x384xf32> to vector<1x128xf32>
    %47 = vector.extract_strided_slice %43 {offsets = [0, 128], sizes = [1, 128], strides = [1, 1]} : vector<1x384xf32> to vector<1x128xf32>
    %48 = vector.extract_strided_slice %43 {offsets = [0, 256], sizes = [1, 128], strides = [1, 1]} : vector<1x384xf32> to vector<1x128xf32>
    %49 = arith.mulf %47, %32 : vector<1x128xf32>
    %50 = arith.mulf %46, %45 : vector<1x128xf32>
    %51 = arith.addf %49, %50 : vector<1x128xf32>
    %52 = math.tanh %51 : vector<1x128xf32>
    %53 = arith.mulf %48, %52 : vector<1x128xf32>
    %54 = vector.extract_strided_slice %12 {offsets = [2, 0], sizes = [1, 512], strides = [1, 1]} : vector<8x512xf32> to vector<1x512xf32>
    %cst_16 = arith.constant dense<0.000000e+00> : vector<1x512xf32>
    %55 = tpu.matmul %53, %13, %cst_16 {dimension_numbers = #tpu.dot_dimension_numbers<[1], [0], [0], [1], [0, 0, 1, 1], [], []>} : vector<1x128xf32>, vector<128x512xf32>, vector<1x512xf32> -> vector<1x512xf32>
    %56 = arith.addf %54, %55 : vector<1x512xf32>
    %57 = vector.extract_strided_slice %56 {offsets = [0, 0], sizes = [1, 384], strides = [1, 1]} : vector<1x512xf32> to vector<1x384xf32>
    %58 = arith.negf %57 : vector<1x384xf32>
    %59 = math.exp %58 : vector<1x384xf32>
    %cst_17 = arith.constant 1.000000e+00 : f32
    %60 = vector.broadcast %cst_17 : f32 to vector<1x384xf32>
    %61 = arith.addf %60, %59 : vector<1x384xf32>
    %62 = arith.divf %60, %61 : vector<1x384xf32>
    %63 = vector.extract_strided_slice %56 {offsets = [0, 384], sizes = [1, 128], strides = [1, 1]} : vector<1x512xf32> to vector<1x128xf32>
    %64 = math.tanh %63 : vector<1x128xf32>
    %65 = vector.extract_strided_slice %62 {offsets = [0, 0], sizes = [1, 128], strides = [1, 1]} : vector<1x384xf32> to vector<1x128xf32>
    %66 = vector.extract_strided_slice %62 {offsets = [0, 128], sizes = [1, 128], strides = [1, 1]} : vector<1x384xf32> to vector<1x128xf32>
    %67 = vector.extract_strided_slice %62 {offsets = [0, 256], sizes = [1, 128], strides = [1, 1]} : vector<1x384xf32> to vector<1x128xf32>
    %68 = arith.mulf %66, %51 : vector<1x128xf32>
    %69 = arith.mulf %65, %64 : vector<1x128xf32>
    %70 = arith.addf %68, %69 : vector<1x128xf32>
    %71 = math.tanh %70 : vector<1x128xf32>
    %72 = arith.mulf %67, %71 : vector<1x128xf32>
    %73 = vector.extract_strided_slice %12 {offsets = [3, 0], sizes = [1, 512], strides = [1, 1]} : vector<8x512xf32> to vector<1x512xf32>
    %cst_18 = arith.constant dense<0.000000e+00> : vector<1x512xf32>
    %74 = tpu.matmul %72, %13, %cst_18 {dimension_numbers = #tpu.dot_dimension_numbers<[1], [0], [0], [1], [0, 0, 1, 1], [], []>} : vector<1x128xf32>, vector<128x512xf32>, vector<1x512xf32> -> vector<1x512xf32>
    %75 = arith.addf %73, %74 : vector<1x512xf32>
    %76 = vector.extract_strided_slice %75 {offsets = [0, 0], sizes = [1, 384], strides = [1, 1]} : vector<1x512xf32> to vector<1x384xf32>
    %77 = arith.negf %76 : vector<1x384xf32>
    %78 = math.exp %77 : vector<1x384xf32>
    %cst_19 = arith.constant 1.000000e+00 : f32
    %79 = vector.broadcast %cst_19 : f32 to vector<1x384xf32>
    %80 = arith.addf %79, %78 : vector<1x384xf32>
    %81 = arith.divf %79, %80 : vector<1x384xf32>
    %82 = vector.extract_strided_slice %75 {offsets = [0, 384], sizes = [1, 128], strides = [1, 1]} : vector<1x512xf32> to vector<1x128xf32>
    %83 = math.tanh %82 : vector<1x128xf32>
    %84 = vector.extract_strided_slice %81 {offsets = [0, 0], sizes = [1, 128], strides = [1, 1]} : vector<1x384xf32> to vector<1x128xf32>
    %85 = vector.extract_strided_slice %81 {offsets = [0, 128], sizes = [1, 128], strides = [1, 1]} : vector<1x384xf32> to vector<1x128xf32>
    %86 = vector.extract_strided_slice %81 {offsets = [0, 256], sizes = [1, 128], strides = [1, 1]} : vector<1x384xf32> to vector<1x128xf32>
    %87 = arith.mulf %85, %70 : vector<1x128xf32>
    %88 = arith.mulf %84, %83 : vector<1x128xf32>
    %89 = arith.addf %87, %88 : vector<1x128xf32>
    %90 = math.tanh %89 : vector<1x128xf32>
    %91 = arith.mulf %86, %90 : vector<1x128xf32>
    %92 = vector.extract_strided_slice %12 {offsets = [4, 0], sizes = [1, 512], strides = [1, 1]} : vector<8x512xf32> to vector<1x512xf32>
    %cst_20 = arith.constant dense<0.000000e+00> : vector<1x512xf32>
    %93 = tpu.matmul %91, %13, %cst_20 {dimension_numbers = #tpu.dot_dimension_numbers<[1], [0], [0], [1], [0, 0, 1, 1], [], []>} : vector<1x128xf32>, vector<128x512xf32>, vector<1x512xf32> -> vector<1x512xf32>
    %94 = arith.addf %92, %93 : vector<1x512xf32>
    %95 = vector.extract_strided_slice %94 {offsets = [0, 0], sizes = [1, 384], strides = [1, 1]} : vector<1x512xf32> to vector<1x384xf32>
    %96 = arith.negf %95 : vector<1x384xf32>
    %97 = math.exp %96 : vector<1x384xf32>
    %cst_21 = arith.constant 1.000000e+00 : f32
    %98 = vector.broadcast %cst_21 : f32 to vector<1x384xf32>
    %99 = arith.addf %98, %97 : vector<1x384xf32>
    %100 = arith.divf %98, %99 : vector<1x384xf32>
    %101 = vector.extract_strided_slice %94 {offsets = [0, 384], sizes = [1, 128], strides = [1, 1]} : vector<1x512xf32> to vector<1x128xf32>
    %102 = math.tanh %101 : vector<1x128xf32>
    %103 = vector.extract_strided_slice %100 {offsets = [0, 0], sizes = [1, 128], strides = [1, 1]} : vector<1x384xf32> to vector<1x128xf32>
    %104 = vector.extract_strided_slice %100 {offsets = [0, 128], sizes = [1, 128], strides = [1, 1]} : vector<1x384xf32> to vector<1x128xf32>
    %105 = vector.extract_strided_slice %100 {offsets = [0, 256], sizes = [1, 128], strides = [1, 1]} : vector<1x384xf32> to vector<1x128xf32>
    %106 = arith.mulf %104, %89 : vector<1x128xf32>
    %107 = arith.mulf %103, %102 : vector<1x128xf32>
    %108 = arith.addf %106, %107 : vector<1x128xf32>
    %109 = math.tanh %108 : vector<1x128xf32>
    %110 = arith.mulf %105, %109 : vector<1x128xf32>
    %111 = vector.extract_strided_slice %12 {offsets = [5, 0], sizes = [1, 512], strides = [1, 1]} : vector<8x512xf32> to vector<1x512xf32>
    %cst_22 = arith.constant dense<0.000000e+00> : vector<1x512xf32>
    %112 = tpu.matmul %110, %13, %cst_22 {dimension_numbers = #tpu.dot_dimension_numbers<[1], [0], [0], [1], [0, 0, 1, 1], [], []>} : vector<1x128xf32>, vector<128x512xf32>, vector<1x512xf32> -> vector<1x512xf32>
    %113 = arith.addf %111, %112 : vector<1x512xf32>
    %114 = vector.extract_strided_slice %113 {offsets = [0, 0], sizes = [1, 384], strides = [1, 1]} : vector<1x512xf32> to vector<1x384xf32>
    %115 = arith.negf %114 : vector<1x384xf32>
    %116 = math.exp %115 : vector<1x384xf32>
    %cst_23 = arith.constant 1.000000e+00 : f32
    %117 = vector.broadcast %cst_23 : f32 to vector<1x384xf32>
    %118 = arith.addf %117, %116 : vector<1x384xf32>
    %119 = arith.divf %117, %118 : vector<1x384xf32>
    %120 = vector.extract_strided_slice %113 {offsets = [0, 384], sizes = [1, 128], strides = [1, 1]} : vector<1x512xf32> to vector<1x128xf32>
    %121 = math.tanh %120 : vector<1x128xf32>
    %122 = vector.extract_strided_slice %119 {offsets = [0, 0], sizes = [1, 128], strides = [1, 1]} : vector<1x384xf32> to vector<1x128xf32>
    %123 = vector.extract_strided_slice %119 {offsets = [0, 128], sizes = [1, 128], strides = [1, 1]} : vector<1x384xf32> to vector<1x128xf32>
    %124 = vector.extract_strided_slice %119 {offsets = [0, 256], sizes = [1, 128], strides = [1, 1]} : vector<1x384xf32> to vector<1x128xf32>
    %125 = arith.mulf %123, %108 : vector<1x128xf32>
    %126 = arith.mulf %122, %121 : vector<1x128xf32>
    %127 = arith.addf %125, %126 : vector<1x128xf32>
    %128 = math.tanh %127 : vector<1x128xf32>
    %129 = arith.mulf %124, %128 : vector<1x128xf32>
    %130 = vector.extract_strided_slice %12 {offsets = [6, 0], sizes = [1, 512], strides = [1, 1]} : vector<8x512xf32> to vector<1x512xf32>
    %cst_24 = arith.constant dense<0.000000e+00> : vector<1x512xf32>
    %131 = tpu.matmul %129, %13, %cst_24 {dimension_numbers = #tpu.dot_dimension_numbers<[1], [0], [0], [1], [0, 0, 1, 1], [], []>} : vector<1x128xf32>, vector<128x512xf32>, vector<1x512xf32> -> vector<1x512xf32>
    %132 = arith.addf %130, %131 : vector<1x512xf32>
    %133 = vector.extract_strided_slice %132 {offsets = [0, 0], sizes = [1, 384], strides = [1, 1]} : vector<1x512xf32> to vector<1x384xf32>
    %134 = arith.negf %133 : vector<1x384xf32>
    %135 = math.exp %134 : vector<1x384xf32>
    %cst_25 = arith.constant 1.000000e+00 : f32
    %136 = vector.broadcast %cst_25 : f32 to vector<1x384xf32>
    %137 = arith.addf %136, %135 : vector<1x384xf32>
    %138 = arith.divf %136, %137 : vector<1x384xf32>
    %139 = vector.extract_strided_slice %132 {offsets = [0, 384], sizes = [1, 128], strides = [1, 1]} : vector<1x512xf32> to vector<1x128xf32>
    %140 = math.tanh %139 : vector<1x128xf32>
    %141 = vector.extract_strided_slice %138 {offsets = [0, 0], sizes = [1, 128], strides = [1, 1]} : vector<1x384xf32> to vector<1x128xf32>
    %142 = vector.extract_strided_slice %138 {offsets = [0, 128], sizes = [1, 128], strides = [1, 1]} : vector<1x384xf32> to vector<1x128xf32>
    %143 = vector.extract_strided_slice %138 {offsets = [0, 256], sizes = [1, 128], strides = [1, 1]} : vector<1x384xf32> to vector<1x128xf32>
    %144 = arith.mulf %142, %127 : vector<1x128xf32>
    %145 = arith.mulf %141, %140 : vector<1x128xf32>
    %146 = arith.addf %144, %145 : vector<1x128xf32>
    %147 = math.tanh %146 : vector<1x128xf32>
    %148 = arith.mulf %143, %147 : vector<1x128xf32>
    %149 = vector.extract_strided_slice %12 {offsets = [7, 0], sizes = [1, 512], strides = [1, 1]} : vector<8x512xf32> to vector<1x512xf32>
    %cst_26 = arith.constant dense<0.000000e+00> : vector<1x512xf32>
    %150 = tpu.matmul %148, %13, %cst_26 {dimension_numbers = #tpu.dot_dimension_numbers<[1], [0], [0], [1], [0, 0, 1, 1], [], []>} : vector<1x128xf32>, vector<128x512xf32>, vector<1x512xf32> -> vector<1x512xf32>
    %151 = arith.addf %149, %150 : vector<1x512xf32>
    %152 = vector.extract_strided_slice %151 {offsets = [0, 0], sizes = [1, 384], strides = [1, 1]} : vector<1x512xf32> to vector<1x384xf32>
    %153 = arith.negf %152 : vector<1x384xf32>
    %154 = math.exp %153 : vector<1x384xf32>
    %cst_27 = arith.constant 1.000000e+00 : f32
    %155 = vector.broadcast %cst_27 : f32 to vector<1x384xf32>
    %156 = arith.addf %155, %154 : vector<1x384xf32>
    %157 = arith.divf %155, %156 : vector<1x384xf32>
    %158 = vector.extract_strided_slice %151 {offsets = [0, 384], sizes = [1, 128], strides = [1, 1]} : vector<1x512xf32> to vector<1x128xf32>
    %159 = math.tanh %158 : vector<1x128xf32>
    %160 = vector.extract_strided_slice %157 {offsets = [0, 0], sizes = [1, 128], strides = [1, 1]} : vector<1x384xf32> to vector<1x128xf32>
    %161 = vector.extract_strided_slice %157 {offsets = [0, 128], sizes = [1, 128], strides = [1, 1]} : vector<1x384xf32> to vector<1x128xf32>
    %162 = vector.extract_strided_slice %157 {offsets = [0, 256], sizes = [1, 128], strides = [1, 1]} : vector<1x384xf32> to vector<1x128xf32>
    %163 = arith.mulf %161, %146 : vector<1x128xf32>
    %164 = arith.mulf %160, %159 : vector<1x128xf32>
    %165 = arith.addf %163, %164 : vector<1x128xf32>
    %166 = math.tanh %165 : vector<1x128xf32>
    %167 = arith.mulf %162, %166 : vector<1x128xf32>
    %c0_28 = arith.constant 0 : index
    %c0_29 = arith.constant 0 : index
    %168 = vector.load %arg5[%c0_28, %c0_29] : memref<128x128xf32, #tpu.memory_space<vmem>>, vector<128x128xf32>
    %cst_30 = arith.constant dense<0.000000e+00> : vector<1x128xf32>
    %169 = tpu.matmul %167, %168, %cst_30 {dimension_numbers = #tpu.dot_dimension_numbers<[1], [0], [0], [1], [0, 0, 1, 1], [], []>} : vector<1x128xf32>, vector<128x128xf32>, vector<1x128xf32> -> vector<1x128xf32>
    %c0_31 = arith.constant 0 : index
    %c0_32 = arith.constant 0 : index
    %170 = vector.load %arg6[%c0_31, %c0_32] : memref<1x128xf32, #tpu.memory_space<vmem>>, vector<1x128xf32>
    %171 = arith.addf %169, %170 : vector<1x128xf32>
    %cst_33 = arith.constant 0.000000e+00 : f32
    %172 = vector.broadcast %cst_33 : f32 to vector<1x128xf32>
    %173 = arith.maximumf %171, %172 : vector<1x128xf32>
    %c0_34 = arith.constant 0 : index
    %c0_35 = arith.constant 0 : index
    %174 = vector.load %arg7[%c0_34, %c0_35] : memref<128x32xf32, #tpu.memory_space<vmem>>, vector<128x32xf32>
    %cst_36 = arith.constant dense<0.000000e+00> : vector<1x32xf32>
    %175 = tpu.matmul %173, %174, %cst_36 {dimension_numbers = #tpu.dot_dimension_numbers<[1], [0], [0], [1], [0, 0, 1, 1], [], []>} : vector<1x128xf32>, vector<128x32xf32>, vector<1x32xf32> -> vector<1x32xf32>
    %c0_37 = arith.constant 0 : index
    %c0_38 = arith.constant 0 : index
    %176 = vector.load %arg8[%c0_37, %c0_38] : memref<1x32xf32, #tpu.memory_space<vmem>>, vector<1x32xf32>
    %177 = arith.addf %175, %176 : vector<1x32xf32>
    %cst_39 = arith.constant dense<0xFF800000> : vector<1xf32>
    %178 = vector.multi_reduction <maximumf>, %177, %cst_39 [1] : vector<1x32xf32> to vector<1xf32>
    %179 = vector.shape_cast %178 : vector<1xf32> to vector<1x1xf32>
    %180 = vector.broadcast %179 : vector<1x1xf32> to vector<1x32xf32>
    %181 = arith.subf %177, %180 : vector<1x32xf32>
    %182 = math.exp %181 : vector<1x32xf32>
    %cst_40 = arith.constant dense<0.000000e+00> : vector<1xf32>
    %183 = vector.multi_reduction <add>, %182, %cst_40 [1] : vector<1x32xf32> to vector<1xf32>
    %184 = vector.shape_cast %183 : vector<1xf32> to vector<1x1xf32>
    %185 = math.log %184 : vector<1x1xf32>
    %186 = vector.broadcast %185 : vector<1x1xf32> to vector<1x32xf32>
    %187 = arith.subf %181, %186 : vector<1x32xf32>
    %c0_41 = arith.constant 0 : index
    %c0_42 = arith.constant 0 : index
    %188 = vector.load %arg9[%c0_41, %c0_42] : memref<1x32xf32, #tpu.memory_space<vmem>>, vector<1x32xf32>
    tpu.vector_store %arg9[%c0_41, %c0_42], %187 {strides = array<i32>} : memref<1x32xf32, #tpu.memory_space<vmem>>, vector<1x32xf32>,
    return
  }
}

</mosaic_0001>

<bundles_post_ra>
// kernel: tpu_custom_call.1
= control target key start
LH: loop header
LB: loop body
LE: loop exit
PB: predicated region body
PF: predicated region fallthrough
CT: control target
= control target key end

     0   :  { %14 = vsyncpa [#allocation3], 0  ;;  %s3037_s0 = inlined_call_operand.vmem [shape: s32[8,1], index: 0, kind: input, shape index: {}]   ;;  %s3038_s1 = inlined_call_operand.vmem [shape: f32[32,16], index: 1, kind: input, shape index: {}]   ;;  %s3039_s2 = inlined_call_operand.hbm [shape: f32[16,512], index: 2, kind: input, shape index: {}]   ;;  %s3040_s3 = inlined_call_operand.hbm [shape: f32[128,512], index: 3, kind: input, shape index: {}]   ;;  %s3041_s4 = inlined_call_operand.vmem [shape: f32[1,512], index: 4, kind: input, shape index: {}]   ;;  %s3042_s5 = inlined_call_operand.vmem [shape: f32[128,128], index: 5, kind: input, shape index: {}]   ;;  %s3043_s6 = inlined_call_operand.vmem [shape: f32[1,128], index: 6, kind: input, shape index: {}]   ;;  %s3044_s7 = inlined_call_operand.vmem [shape: f32[128,32], index: 7, kind: input, shape index: {}]   ;;  %s3045_s8 = inlined_call_operand.vmem [shape: f32[1,32], index: 8, kind: input, shape index: {}]   ;;  %s3046_s9 = inlined_call_operand.hbm [shape: f32[1,32], index: 9, kind: output, shape index: {}]  }
   0x1   :  { %15 = vsyncpa [#allocation6], 0 }
   0x2   :  { %16 = vsyncpa [#allocation4], 0  ;;  %s25_s11 = sshll.u32 %s3039_s2, 4  ;;  %s1989_s12 = smov [#allocation2]   ;;  %s26_s11 = int_to_ptr.hbm [resolvable:$true] %s25_s11 }
   0x3   :  { %s27_s13 = sshll.u32 %s1989_s12, 4  ;;  %s38_s16 = sshll.u32 %s3040_s3, 4  ;;  %s28_s13 = int_to_ptr.vmem [resolvable:$true] %s27_s13  ;;  %s39_s16 = int_to_ptr.hbm [resolvable:$true] %s38_s16 }
   0x4   :  { %s1990_s17 = smov 512   ;;  %s1991_s18 = smov 32  }
   0x5   :  { %33 = dma.hbm_to_vmem [thread:$0]  %s26_s11, 1024, %s28_s13, [#allocation3], %s1990_s17, %s1990_s17, %s1991_s18  }
   0x6   :  { %s1992_s19 = smov [#allocation5]  }
   0x7   :  { %s40_s20 = sshll.u32 %s1992_s19, 4  ;;  %s41_s20 = int_to_ptr.vmem [resolvable:$true] %s40_s20 }
   0x8   :  { %46 = dma.hbm_to_vmem [thread:$0]  %s39_s16, 8192, %s41_s20, [#allocation6], %s1990_s17, %s1990_s17, %s1991_s18  }
   0x9   :  { %1983 = dma.done.wait [#allocation3], 1024  }
   0xa   :  { %1984 = vsyncadd [#allocation3], 4294966272 }
   0xb   :  { %1985 = dma.done.wait [#allocation6], 8192  }
   0xc   :  { %1986 = vsyncadd [#allocation6], 4294959104  ;;  %v1993_v0 = vmov 0   ;;  %v65_v1 = vld [vmem:[%s3037_s0] sm:$0xff]  ;;  %v77_v2 = vld [vmem:[%s3038_s1 + $0x18] sm:$0xff]  ;;  %v66_v33 = vlaneseq  ;;  %vm78_vm0 = vcmask 261120  }
   0xd   :  { %1714 = vset.pattern.permute.xlu0 %v1993_v0  ;;  %v76_v3 = vld [vmem:[%s3038_s1 + $0x10] sm:$0xff]  ;;  %94 = vmatpush.msra.mxu0 %v77_v2  ;;  %v75_v4 = vld [vmem:[%s3038_s1 + $0x8] sm:$0xff]  ;;  %v74_v5 = vld [vmem:[%s3038_s1] sm:$0xff]  ;;  %v3047_v45 = vmov 0.0   ;;  %vm120_vm2 = vcmask 130048   ;;  %s1666_s21 = sshll.u32 %s3046_s9, 4  ;;  %s1667_s21 = int_to_ptr.hbm [resolvable:$true] %s1666_s21 }
   0xe   :  { %69 = vperm.xlu0 %1714, %v65_v1   ;;  %v2067_v6 = vld [vmem:[#allocation5 + $0x1e0] sm:$0xff]  ;;  %v2069_v7 = vld [vmem:[#allocation5 + $0x1e8] sm:$0xff]  ;;  %v67_v38 = vand.u32 127, %v66_v33  ;;  %v2161_v44 = vld [vmem:[#allocation5 + $0x1f0] sm:$0xff] }
   0xf   :  { %95 = vmatpush.msra.mxu0 %v76_v3  ;;  %v2071_v8 = vld [vmem:[#allocation5 + $0x1c0] sm:$0xff]  ;;  %268 = vmatpush.msra.mxu2 %v2067_v6  ;;  %v2075_v9 = vld [vmem:[#allocation5 + $0x1c8] sm:$0xff]  ;;  %v2166_v47 = vld [vmem:[#allocation5 + $0x1d0] sm:$0xff] }
  0x10   :  { %288 = vmatpush.msra.mxu3 %v2069_v7  ;;  %v2077_v10 = vld [vmem:[#allocation5 + $0x1a0] sm:$0xff]  ;;  %v2079_v11 = vld [vmem:[#allocation5 + $0x1a8] sm:$0xff]  ;;  %v2171_v48 = vld [vmem:[#allocation5 + $0x1b0] sm:$0xff] }
  0x11   :  { %96 = vmatpush.msra.mxu0 %v75_v4  ;;  %269 = vmatpush.msra.mxu2 %v2071_v8  ;;  %v2083_v12 = vld [vmem:[#allocation5 + $0x180] sm:$0xff]  ;;  %v2085_v13 = vld [vmem:[#allocation5 + $0x188] sm:$0xff]  ;;  %v2176_v49 = vld [vmem:[#allocation5 + $0x190] sm:$0xff] }
  0x12   :  { %289 = vmatpush.msra.mxu3 %v2075_v9  ;;  %v107_v14 = vld [vmem:[#allocation2 + $0x28] sm:$0xff]  ;;  %v2089_v16 = vld [vmem:[#allocation5 + $0x160] sm:$0xff]  ;;  %v2181_v50 = vld [vmem:[#allocation5 + $0x170] sm:$0xff] }
  0x13   :  { %97 = vmatpush.msra.mxu0 %v74_v5  ;;  %270 = vmatpush.msra.mxu2 %v2077_v10  ;;  %v103_v15 = vld [vmem:[#allocation2 + $0x8] sm:$0xff]  ;;  %v2095_v18 = vld [vmem:[#allocation5 + $0x140] sm:$0xff]  ;;  %v2186_v51 = vld [vmem:[#allocation5 + $0x150] sm:$0xff] }
  0x14   :  { %290 = vmatpush.msra.mxu3 %v2079_v11  ;;  %v2091_v17 = vld [vmem:[#allocation5 + $0x168] sm:$0xff]  ;;  %v2101_v20 = vld [vmem:[#allocation5 + $0x120] sm:$0xff]  ;;  %v2191_v52 = vld [vmem:[#allocation5 + $0x130] sm:$0xff] }
  0x15   :  { %158 = vmatpush.msrb.mxu0 %v107_v14  ;;  %271 = vmatpush.msra.mxu2 %v2083_v12  ;;  %v2097_v19 = vld [vmem:[#allocation5 + $0x148] sm:$0xff]  ;;  %v2107_v22 = vld [vmem:[#allocation5 + $0x100] sm:$0xff]  ;;  %v2196_v53 = vld [vmem:[#allocation5 + $0x110] sm:$0xff] }
  0x16   :  { %291 = vmatpush.msra.mxu3 %v2085_v13  ;;  %v2103_v21 = vld [vmem:[#allocation5 + $0x128] sm:$0xff]  ;;  %v2113_v24 = vld [vmem:[#allocation5 + $0xe0] sm:$0xff]  ;;  %v2201_v54 = vld [vmem:[#allocation5 + $0xf0] sm:$0xff] }
  0x17   :  { %159 = vmatpush.msrb.mxu0 %v103_v15  ;;  %272 = vmatpush.msra.mxu2 %v2089_v16  ;;  %v2109_v23 = vld [vmem:[#allocation5 + $0x108] sm:$0xff]  ;;  %v2119_v26 = vld [vmem:[#allocation5 + $0xc0] sm:$0xff]  ;;  %v2206_v55 = vld [vmem:[#allocation5 + $0xd0] sm:$0xff] }
  0x18   :  { %292 = vmatpush.msra.mxu3 %v2091_v17  ;;  %v2115_v25 = vld [vmem:[#allocation5 + $0xe8] sm:$0xff]  ;;  %v106_v28 = vld [vmem:[#allocation2 + $0x20] sm:$0xff]  ;;  %3154 = vst [vmem:[#allocation23_spill] sm:$0xff] %v2206_v55  ;;  %v2260_v57 = vld [vmem:[#allocation5 + $0xb0] sm:$0xff] }
  0x19   :  { %273 = vmatpush.msra.mxu2 %v2095_v18  ;;  %v2121_v27 = vld [vmem:[#allocation5 + $0xc8] sm:$0xff]  ;;  %v2125_v29 = vld [vmem:[#allocation5 + $0xa0] sm:$0xff]  ;;  %138 = vmatpush.msra.mxu1 %v106_v28  ;;  %3155 = vst [vmem:[#allocation24_spill] sm:$0xff] %v2260_v57  ;;  %v108_v58 = vld [vmem:[#allocation2 + $0x30] sm:$0xff] }
  0x1a   :  { %293 = vmatpush.msra.mxu3 %v2097_v19  ;;  %3142 = vst [vmem:[#allocation11_spill] sm:$0xff] %v2125_v29  ;;  %v2127_v30 = vld [vmem:[#allocation5 + $0xa8] sm:$0xff]  ;;  %v2131_v31 = vld [vmem:[#allocation5 + $0x80] sm:$0xff]  ;;  %v2263_v59 = vld [vmem:[#allocation5 + $0x90] sm:$0xff] }
  0x1b   :  { %274 = vmatpush.msra.mxu2 %v2101_v20  ;;  %3143 = vst [vmem:[#allocation12_spill] sm:$0xff] %v2127_v30  ;;  %v2133_v32 = vld [vmem:[#allocation5 + $0x88] sm:$0xff]  ;;  %v2137_v34 = vld [vmem:[#allocation5 + $0x60] sm:$0xff]  ;;  %v2265_v60 = vld [vmem:[#allocation5 + $0x70] sm:$0xff] }
  0x1c   :  { %294 = vmatpush.msra.mxu3 %v2103_v21  ;;  %3144 = vst [vmem:[#allocation13_spill] sm:$0xff] %v2131_v31  ;;  %v2139_v35 = vld [vmem:[#allocation5 + $0x68] sm:$0xff]  ;;  %v2143_v36 = vld [vmem:[#allocation5 + $0x40] sm:$0xff]  ;;  %v104_v61 = vld [vmem:[#allocation2 + $0x10] sm:$0xff] }
  0x1d   :  { %275 = vmatpush.msra.mxu2 %v2107_v22  ;;  %3145 = vst [vmem:[#allocation14_spill] sm:$0xff] %v2133_v32  ;;  %v2145_v37 = vld [vmem:[#allocation5 + $0x48] sm:$0xff]  ;;  %v2149_v39 = vld [vmem:[#allocation5 + $0x20] sm:$0xff]  ;;  %v2268_v62 = vld [vmem:[#allocation5 + $0x50] sm:$0xff] }
  0x1e   :  { %295 = vmatpush.msra.mxu3 %v2109_v23  ;;  %3146 = vst [vmem:[#allocation15_spill] sm:$0xff] %v2137_v34  ;;  %v2151_v40 = vld [vmem:[#allocation5 + $0x28] sm:$0xff]  ;;  %v2155_v41 = vld [vmem:[#allocation5] sm:$0xff]  ;;  %v2271_v63 = vld [vmem:[#allocation5 + $0x30] sm:$0xff] }
  0x1f   :  { %276 = vmatpush.msra.mxu2 %v2113_v24  ;;  %3147 = vst [vmem:[#allocation16_spill] sm:$0xff] %v2139_v35  ;;  %v2157_v42 = vld [vmem:[#allocation5 + $0x8] sm:$0xff]  ;;  %v102_v56 = vld [vmem:[#allocation2] sm:$0xff]  ;;  %v2275_v0 = vld [vmem:[#allocation5 + $0x10] sm:$0xff] }
  0x20   :  { %296 = vmatpush.msra.mxu3 %v2115_v25  ;;  %3148 = vst [vmem:[#allocation17_spill] sm:$0xff] %v2143_v36  ;;  %139 = vmatpush.msra.mxu1 %v102_v56  ;;  %v109_v1 = vld [vmem:[#allocation2 + $0x38] sm:$0xff] }
  0x21   :  { %277 = vmatpush.msra.mxu2 %v2119_v26  ;;  %3149 = vst [vmem:[#allocation18_spill] sm:$0xff] %v2145_v37  ;;  %v105_v3 = vld [vmem:[#allocation2 + $0x18] sm:$0xff] }
  0x22   :  { %297 = vmatpush.msra.mxu3 %v2121_v27  ;;  %3150 = vst [vmem:[#allocation19_spill] sm:$0xff] %v2149_v39  ;;  %178 = vmatpush.msrb.mxu1 %v108_v58  ;;  %v2283_v4 = vld [vmem:[#allocation5 + $0x1f8] sm:$0xff] }
  0x23   :  { %278 = vmatpush.msra.mxu2 %v2125_v29  ;;  %3151 = vst [vmem:[#allocation20_spill] sm:$0xff] %v2151_v40  ;;  %v2288_v5 = vld [vmem:[#allocation5 + $0x1d8] sm:$0xff] }
  0x24   :  { %298 = vmatpush.msra.mxu3 %v2127_v30  ;;  %3152 = vst [vmem:[#allocation21_spill] sm:$0xff] %v2155_v41  ;;  %179 = vmatpush.msrb.mxu1 %v104_v61  ;;  %v2292_v14 = vld [vmem:[#allocation5 + $0x1b8] sm:$0xff] }
  0x25   :  { %279 = vmatpush.msra.mxu2 %v2131_v31  ;;  %3153 = vst [vmem:[#allocation22_spill] sm:$0xff] %v2157_v42  ;;  %v2296_v15 = vld [vmem:[#allocation5 + $0x198] sm:$0xff] }
  0x26   :  { %299 = vmatpush.msra.mxu3 %v2133_v32  ;;  %3156 = vst [vmem:[#allocation25_spill] sm:$0xff] %v2263_v59  ;;  %v2300_v28 = vld [vmem:[#allocation5 + $0x178] sm:$0xff] }
  0x27   :  { %280 = vmatpush.msra.mxu2 %v2137_v34  ;;  %3157 = vst [vmem:[#allocation26_spill] sm:$0xff] %v2265_v60  ;;  %v2305_v33 = vld [vmem:[#allocation5 + $0x158] sm:$0xff] }
  0x28   :  { %300 = vmatpush.msra.mxu3 %v2139_v35  ;;  %3158 = vst [vmem:[#allocation27_spill] sm:$0xff] %v2268_v62  ;;  %v2321_v56 = vld [vmem:[#allocation5 + $0xd8] sm:$0xff] }
  0x29   :  { %281 = vmatpush.msra.mxu2 %v2143_v36  ;;  %3159 = vst [vmem:[#allocation28_spill] sm:$0xff] %v2271_v63  ;;  %v2325_v58 = vld [vmem:[#allocation5 + $0xb8] sm:$0xff] }
  0x2a   :  { %301 = vmatpush.msra.mxu3 %v2145_v37  ;;  %3160 = vst [vmem:[#allocation29_spill] sm:$0xff] %v2275_v0  ;;  %v2329_v61 = vld [vmem:[#allocation5 + $0x98] sm:$0xff] }
  0x2b   :  { %282 = vmatpush.msra.mxu2 %v2149_v39  ;;  %3161 = vst [vmem:[#allocation30_spill] sm:$0xff] %v2321_v56 }
  0x2c   :  { %302 = vmatpush.msra.mxu3 %v2151_v40  ;;  %3162 = vst [vmem:[#allocation31_spill] sm:$0xff] %v2325_v58 }
  0x2d   :  { %283 = vmatpush.msra.mxu2 %v2155_v41  ;;  %3163 = vst [vmem:[#allocation32_spill] sm:$0xff] %v2329_v61 }
  0x2e   :  { %303 = vmatpush.msra.mxu3 %v2157_v42  ;;  %284 = vmatmul.f32.vlgmr.msra.gmra.mxu2 %v3047_v45 }
  0x2f   :  { %304 = vmatmul.f32.vlgmr.msra.gmra.mxu3 %v3047_v45  ;;  %415 = vmatpush.msrb.mxu2 %v2067_v6 }
  0x30   :  { %435 = vmatpush.msrb.mxu3 %v2069_v7 }
  0x31   :  { %416 = vmatpush.msrb.mxu2 %v2071_v8 }
  0x32   :  { %436 = vmatpush.msrb.mxu3 %v2075_v9 }
  0x33   :  { %417 = vmatpush.msrb.mxu2 %v2077_v10 }
  0x34   :  { %437 = vmatpush.msrb.mxu3 %v2079_v11 }
  0x35   :  { %418 = vmatpush.msrb.mxu2 %v2083_v12 }
  0x36   :  { %438 = vmatpush.msrb.mxu3 %v2085_v13 }
  0x37   :  { %419 = vmatpush.msrb.mxu2 %v2089_v16 }
  0x38   :  { %439 = vmatpush.msrb.mxu3 %v2091_v17 }
  0x39   :  { %420 = vmatpush.msrb.mxu2 %v2095_v18 }
  0x3a   :  { %440 = vmatpush.msrb.mxu3 %v2097_v19 }
  0x3b   :  { %421 = vmatpush.msrb.mxu2 %v2101_v20 }
  0x3c   :  { %441 = vmatpush.msrb.mxu3 %v2103_v21 }
  0x3d   :  { %422 = vmatpush.msrb.mxu2 %v2107_v22 }
  0x3e   :  { %442 = vmatpush.msrb.mxu3 %v2109_v23 }
  0x3f   :  { %423 = vmatpush.msrb.mxu2 %v2113_v24 }
  0x40   :  { %443 = vmatpush.msrb.mxu3 %v2115_v25 }
  0x41   :  { %424 = vmatpush.msrb.mxu2 %v2119_v26 }
  0x42   :  { %444 = vmatpush.msrb.mxu3 %v2121_v27 }
  0x43   :  { %425 = vmatpush.msrb.mxu2 %v2125_v29 }
  0x44   :  { %445 = vmatpush.msrb.mxu3 %v2127_v30 }
  0x45   :  { %426 = vmatpush.msrb.mxu2 %v2131_v31 }
  0x46   :  { %446 = vmatpush.msrb.mxu3 %v2133_v32 }
  0x47   :  { %427 = vmatpush.msrb.mxu2 %v2137_v34 }
  0x48   :  { %447 = vmatpush.msrb.mxu3 %v2139_v35 }
  0x49   :  { %428 = vmatpush.msrb.mxu2 %v2143_v36 }
  0x4a   :  { %448 = vmatpush.msrb.mxu3 %v2145_v37 }
  0x4b   :  { %429 = vmatpush.msrb.mxu2 %v2149_v39 }
  0x4c   :  { %449 = vmatpush.msrb.mxu3 %v2151_v40 }
  0x4d   :  { %430 = vmatpush.msrb.mxu2 %v2155_v41 }
  0x4e   :  { %450 = vmatpush.msrb.mxu3 %v2157_v42 }
  0x4f   :  { %580 = vmatpush.msra.mxu2 %v2067_v6 }
  0x50   :  { %600 = vmatpush.msra.mxu3 %v2069_v7 }
  0x51   :  { %581 = vmatpush.msra.mxu2 %v2071_v8 }
  0x52   :  { %601 = vmatpush.msra.mxu3 %v2075_v9 }
  0x53   :  { %582 = vmatpush.msra.mxu2 %v2077_v10 }
  0x54   :  { %602 = vmatpush.msra.mxu3 %v2079_v11 }
  0x55   :  { %583 = vmatpush.msra.mxu2 %v2083_v12 }
  0x56   :  { %603 = vmatpush.msra.mxu3 %v2085_v13 }
  0x57   :  { %584 = vmatpush.msra.mxu2 %v2089_v16 }
  0x58   :  { %604 = vmatpush.msra.mxu3 %v2091_v17 }
  0x59   :  { %585 = vmatpush.msra.mxu2 %v2095_v18 }
  0x5a   :  { %605 = vmatpush.msra.mxu3 %v2097_v19 }
  0x5b   :  { %586 = vmatpush.msra.mxu2 %v2101_v20 }
  0x5c   :  { %606 = vmatpush.msra.mxu3 %v2103_v21 }
  0x5d   :  { %587 = vmatpush.msra.mxu2 %v2107_v22 }
  0x5e   :  { %607 = vmatpush.msra.mxu3 %v2109_v23 }
  0x5f   :  { %588 = vmatpush.msra.mxu2 %v2113_v24 }
  0x60   :  { %608 = vmatpush.msra.mxu3 %v2115_v25 }
  0x61   :  { %589 = vmatpush.msra.mxu2 %v2119_v26 }
  0x62   :  { %609 = vmatpush.msra.mxu3 %v2121_v27 }
  0x63   :  { %590 = vmatpush.msra.mxu2 %v2125_v29 }
  0x64   :  { %610 = vmatpush.msra.mxu3 %v2127_v30 }
  0x65   :  { %591 = vmatpush.msra.mxu2 %v2131_v31 }
  0x66   :  { %611 = vmatpush.msra.mxu3 %v2133_v32 }
  0x67   :  { %592 = vmatpush.msra.mxu2 %v2137_v34 }
  0x68   :  { %612 = vmatpush.msra.mxu3 %v2139_v35 }
  0x69   :  { %593 = vmatpush.msra.mxu2 %v2143_v36 }
  0x6a   :  { %613 = vmatpush.msra.mxu3 %v2145_v37 }
  0x6b   :  { %594 = vmatpush.msra.mxu2 %v2149_v39 }
  0x6c   :  { %614 = vmatpush.msra.mxu3 %v2151_v40 }
  0x6d   :  { %595 = vmatpush.msra.mxu2 %v2155_v41 }
  0x6e   :  { %615 = vmatpush.msra.mxu3 %v2157_v42  ;;  %v3168_v42 = vmov 0.0  }
  0x80   :  { %v70_v43 = vpop.permute.xlu0 %69 }
  0x81   :  { %vm71_vm1 = vcmp.eq.s32.totalorder %v67_v38, %v70_v43  ;;  %v2309_v38 = vld [vmem:[#allocation5 + $0x138] sm:$0xff] }
  0x82   :  { %v1677_v46 = vsel %vm71_vm1, 1.0, %v3047_v45  ;;  %v2313_v43 = vld [vmem:[#allocation5 + $0x118] sm:$0xff] }
  0x83   :  { %1678 = vmatmul.msk.f32.vlgmr.msra.gmra.mxu0 %vm78_vm0, %v1677_v46  ;;  %v2317_v46 = vld [vmem:[#allocation5 + $0xf8] sm:$0xff] }
  0x84   :  { %308 = vmatpush.msra.mxu0 %v2161_v44 }
  0x86   :  { %309 = vmatpush.msra.mxu0 %v2166_v47 }
  0x88   :  { %310 = vmatpush.msra.mxu0 %v2171_v48 }
  0x8a   :  { %311 = vmatpush.msra.mxu0 %v2176_v49 }
  0x8c   :  { %312 = vmatpush.msra.mxu0 %v2181_v50 }
  0x8e   :  { %313 = vmatpush.msra.mxu0 %v2186_v51 }
  0x90   :  { %314 = vmatpush.msra.mxu0 %v2191_v52 }
  0x92   :  { %315 = vmatpush.msra.mxu0 %v2196_v53 }
  0x94   :  { %316 = vmatpush.msra.mxu0 %v2201_v54 }
  0x96   :  { %317 = vmatpush.msra.mxu0 %v2206_v55 }
  0x98   :  { %318 = vmatpush.msra.mxu0 %v2260_v57 }
  0x9a   :  { %319 = vmatpush.msra.mxu0 %v2263_v59 }
  0x9c   :  { %320 = vmatpush.msra.mxu0 %v2265_v60 }
  0x9e   :  { %321 = vmatpush.msra.mxu0 %v2268_v62 }
  0xa0   :  { %322 = vmatpush.msra.mxu0 %v2271_v63 }
  0xa2   :  { %323 = vmatpush.msra.mxu0 %v2275_v0 }
  0xb2   :  { %v305_v40 = vpop.f32.mrf.mxu3 }
 0x100   :  { %v99_v2 = vpop.f32.mrf.mxu0 }
 0x101   :  { %1679 = vmatmul.msk.f32.vlgmr.msra.gmra.mxu1 %vm120_vm2, %v99_v2  ;;  %1680 = vmatmul.msk.f32.vlgmr.msrb.gmra.mxu0 %vm120_vm2, %v99_v2 }
 0x102   :  { %198 = vmatpush.msra.mxu1 %v109_v1  ;;  %455 = vmatpush.msrb.mxu0 %v2161_v44  ;;  %v2333_v1 = vld [vmem:[#allocation5 + $0x78] sm:$0xff] }
 0x103   :  { %3164 = vst [vmem:[#allocation33_spill] sm:$0xff] %v2333_v1 }
 0x104   :  { %199 = vmatpush.msra.mxu1 %v105_v3  ;;  %456 = vmatpush.msrb.mxu0 %v2166_v47  ;;  %v2341_v3 = vld [vmem:[#allocation5 + $0x38] sm:$0xff] }
 0x105   :  { %3166 = vst [vmem:[#allocation35_spill] sm:$0xff] %v2341_v3 }
 0x106   :  { %457 = vmatpush.msrb.mxu0 %v2171_v48 }
 0x108   :  { %458 = vmatpush.msrb.mxu0 %v2176_v49 }
 0x109   :  { %1681 = vmatmul.msk.f32.vlgmr.msrb.gmra.mxu1 %vm120_vm2, %v99_v2  ;;  %324 = vmatmul.f32.vlgmr.msra.gmra.mxu0 %v3047_v45  ;;  %v2345_v45 = vld [vmem:[#allocation5 + $0x18] sm:$0xff] }
 0x10a   :  { %328 = vmatpush.msrb.mxu1 %v2283_v4  ;;  %459 = vmatpush.msrb.mxu0 %v2181_v50  ;;  %3167 = vst [vmem:[#allocation36_spill] sm:$0xff] %v2345_v45 }
 0x10c   :  { %329 = vmatpush.msrb.mxu1 %v2288_v5  ;;  %460 = vmatpush.msrb.mxu0 %v2186_v51 }
 0x10e   :  { %330 = vmatpush.msrb.mxu1 %v2292_v14  ;;  %461 = vmatpush.msrb.mxu0 %v2191_v52 }
 0x110   :  { %331 = vmatpush.msrb.mxu1 %v2296_v15  ;;  %462 = vmatpush.msrb.mxu0 %v2196_v53 }
 0x111   :  { %1682 = vmatmul.msk.f32.vlgmr.msra.gmra.mxu1 %vm120_vm2, %v99_v2  ;;  %v2337_v2 = vld [vmem:[#allocation5 + $0x58] sm:$0xff] }
 0x112   :  { %332 = vmatpush.msrb.mxu1 %v2300_v28  ;;  %463 = vmatpush.msrb.mxu0 %v2201_v54  ;;  %3165 = vst [vmem:[#allocation34_spill] sm:$0xff] %v2337_v2 }
 0x114   :  { %333 = vmatpush.msrb.mxu1 %v2305_v33  ;;  %464 = vmatpush.msrb.mxu0 %v2206_v55 }
 0x116   :  { %334 = vmatpush.msrb.mxu1 %v2309_v38  ;;  %465 = vmatpush.msrb.mxu0 %v2260_v57 }
 0x118   :  { %335 = vmatpush.msrb.mxu1 %v2313_v43  ;;  %466 = vmatpush.msrb.mxu0 %v2263_v59 }
 0x11a   :  { %336 = vmatpush.msrb.mxu1 %v2317_v46  ;;  %467 = vmatpush.msrb.mxu0 %v2265_v60 }
 0x11c   :  { %337 = vmatpush.msrb.mxu1 %v2321_v56  ;;  %468 = vmatpush.msrb.mxu0 %v2268_v62 }
 0x11e   :  { %338 = vmatpush.msrb.mxu1 %v2325_v58  ;;  %469 = vmatpush.msrb.mxu0 %v2271_v63 }
 0x120   :  { %339 = vmatpush.msrb.mxu1 %v2329_v61  ;;  %470 = vmatpush.msrb.mxu0 %v2275_v0 }
 0x122   :  { %620 = vmatpush.msra.mxu0 %v2161_v44  ;;  %340 = vmatpush.msrb.mxu1 %v2333_v1 }
 0x124   :  { %621 = vmatpush.msra.mxu0 %v2166_v47  ;;  %341 = vmatpush.msrb.mxu1 %v2337_v2 }
 0x126   :  { %622 = vmatpush.msra.mxu0 %v2171_v48  ;;  %342 = vmatpush.msrb.mxu1 %v2341_v3 }
 0x128   :  { %623 = vmatpush.msra.mxu0 %v2176_v49  ;;  %343 = vmatpush.msrb.mxu1 %v2345_v45 }
 0x129   :  { %344 = vmatmul.f32.vlgmr.msrb.gmra.mxu1 %v3168_v42  ;;  %v110_v42 = vld [vmem:[%s3041_s4] sm:$0xf] }
 0x12a   :  { %624 = vmatpush.msra.mxu0 %v2181_v50  ;;  %475 = vmatpush.msra.mxu1 %v2283_v4  ;;  %v113_v41 = vperm.slane %v110_v42, 1 }
 0x12c   :  { %625 = vmatpush.msra.mxu0 %v2186_v51  ;;  %476 = vmatpush.msra.mxu1 %v2288_v5 }
 0x12e   :  { %626 = vmatpush.msra.mxu0 %v2191_v52  ;;  %477 = vmatpush.msra.mxu1 %v2292_v14 }
 0x130   :  { %627 = vmatpush.msra.mxu0 %v2196_v53  ;;  %478 = vmatpush.msra.mxu1 %v2296_v15 }
 0x132   :  { %628 = vmatpush.msra.mxu0 %v2201_v54  ;;  %479 = vmatpush.msra.mxu1 %v2300_v28 }
 0x134   :  { %629 = vmatpush.msra.mxu0 %v2206_v55  ;;  %480 = vmatpush.msra.mxu1 %v2305_v33 }
 0x136   :  { %630 = vmatpush.msra.mxu0 %v2260_v57  ;;  %481 = vmatpush.msra.mxu1 %v2309_v38 }
 0x138   :  { %631 = vmatpush.msra.mxu0 %v2263_v59  ;;  %482 = vmatpush.msra.mxu1 %v2313_v43 }
 0x13a   :  { %632 = vmatpush.msra.mxu0 %v2265_v60  ;;  %483 = vmatpush.msra.mxu1 %v2317_v46  ;;  %v114_v60 = vperm.slane %v110_v42, 2 }
 0x13c   :  { %633 = vmatpush.msra.mxu0 %v2268_v62  ;;  %484 = vmatpush.msra.mxu1 %v2321_v56 }
 0x13e   :  { %634 = vmatpush.msra.mxu0 %v2271_v63  ;;  %485 = vmatpush.msra.mxu1 %v2325_v58  ;;  %v285_v63 = vpop.f32.mrf.mxu2 }
 0x140   :  { %635 = vmatpush.msra.mxu0 %v2275_v0  ;;  %486 = vmatpush.msra.mxu1 %v2329_v61  ;;  %v112_v0 = vperm.slane %v110_v42, 0 }
 0x142   :  { %487 = vmatpush.msra.mxu1 %v2333_v1 }
 0x144   :  { %488 = vmatpush.msra.mxu1 %v2337_v2 }
 0x146   :  { %489 = vmatpush.msra.mxu1 %v2341_v3 }
 0x148   :  { %490 = vmatpush.msra.mxu1 %v2345_v45 }
 0x14a   :  { %640 = vmatpush.msrb.mxu1 %v2283_v4 }
 0x14c   :  { %641 = vmatpush.msrb.mxu1 %v2288_v5 }
 0x14e   :  { %642 = vmatpush.msrb.mxu1 %v2292_v14 }
 0x150   :  { %643 = vmatpush.msrb.mxu1 %v2296_v15 }
 0x152   :  { %644 = vmatpush.msrb.mxu1 %v2300_v28 }
 0x154   :  { %645 = vmatpush.msrb.mxu1 %v2305_v33 }
 0x156   :  { %646 = vmatpush.msrb.mxu1 %v2309_v38 }
 0x158   :  { %647 = vmatpush.msrb.mxu1 %v2313_v43 }
 0x15a   :  { %648 = vmatpush.msrb.mxu1 %v2317_v46 }
 0x15c   :  { %649 = vmatpush.msrb.mxu1 %v2321_v56 }
 0x15e   :  { %650 = vmatpush.msrb.mxu1 %v2325_v58 }
 0x160   :  { %651 = vmatpush.msrb.mxu1 %v2329_v61 }
 0x162   :  { %652 = vmatpush.msrb.mxu1 %v2333_v1 }
 0x164   :  { %653 = vmatpush.msrb.mxu1 %v2337_v2 }
 0x166   :  { %654 = vmatpush.msrb.mxu1 %v2341_v3 }
 0x168   :  { %655 = vmatpush.msrb.mxu1 %v2345_v45 }
 0x17e   :  { %v141_v39 = vpop.f32.mrf.mxu1  ;;  %v161_v62 = vpop.f32.mrf.mxu0 }
 0x17f   :  { %v2399_v37 = vadd.f32 %v141_v39, %v112_v0  ;;  %v2401_v36 = vadd.f32 %v161_v62, %v113_v41 }
 0x181   :  { %3169 = vst [vmem:[#allocation37_spill] sm:$0xff] %v2399_v37  ;;  %v348_v2 = vadd.f32 %v285_v63, %v2399_v37  ;;  %v349_v3 = vadd.f32 %v305_v40, %v2401_v36  ;;  %v115_v37 = vperm.slane %v110_v42, 3 }
 0x182   :  { %3170 = vst [vmem:[#allocation38_spill] sm:$0xff] %v2401_v36 }
 0x183   :  { %v1683_v1 = vmul.f32 -1.442695, %v348_v2  ;;  %v1684_v45 = vmul.f32 -1.442695, %v349_v3 }
 0x185   :  { %1715 = vpow2.f32 %v1683_v1 }
 0x186   :  { %1717 = vpow2.f32 %v1684_v45  ;;  %v181_v35 = vpop.f32.mrf.mxu1  ;;  %v325_v34 = vpop.f32.mrf.mxu0 }
 0x187   :  { %v2405_v61 = vadd.f32 %v181_v35, %v114_v60 }
 0x189   :  { %3171 = vst [vmem:[#allocation39_spill] sm:$0xff] %v2405_v61  ;;  %v350_v59 = vadd.f32 %v325_v34, %v2405_v61 }
 0x18b   :  { %v1716_v32 = vpop.eup %1715  ;;  %v1685_v0 = vmul.f32 -1.442695, %v350_v59 }
 0x18c   :  { %v1718_v39 = vpop.eup %1717  ;;  %v361_v62 = vadd.f32 1.0, %v1716_v32 }
 0x18d   :  { %v362_v41 = vadd.f32 1.0, %v1718_v39  ;;  %1719 = vpow2.f32 %v1685_v0 }
 0x18e   :  { %v201_v35 = vpop.f32.mrf.mxu1  ;;  %v375_v30 = vand.u32 2147483648, %v361_v62  ;;  %vm369_vm7 = vweird.f32 %v361_v62 }
 0x18f   :  { %1721 = vrcp.f32 %v362_v41  ;;  %v2408_v59 = vadd.f32 %v201_v35, %v115_v37  ;;  %v390_v0 = vand.u32 2147483648, %v362_v41  ;;  %vm384_vm4 = vweird.f32 %v362_v41 }
 0x190   :  { %1723 = vrcp.f32 %v361_v62 }
 0x191   :  { %3172 = vst [vmem:[#allocation40_spill] sm:$0xff] %v2408_v59 }
 0x193   :  { %v1720_v40 = vpop.eup %1719 }
 0x194   :  { %v363_v1 = vadd.f32 1.0, %v1720_v40 }
 0x195   :  { %v1722_v63 = vpop.eup %1721 }
 0x196   :  { %v1724_v2 = vpop.eup %1723  ;;  %v380_v3 = vmul.f32 %v1722_v63, %v362_v41  ;;  %1725 = vrcp.f32 %v363_v1  ;;  %vm385_vm3 = vweird.f32 %v1722_v63  ;;  %vm399_vm12 = vweird.f32 %v363_v1 }
 0x197   :  { %v365_v45 = vmul.f32 %v1724_v2, %v361_v62  ;;  %vm370_vm5 = vweird.f32 %v1724_v2  ;;  %vm386_vm6 = vmor %vm384_vm4, %vm385_vm3 }
 0x198   :  { %v381_v36 = vsub.f32 1.0, %v380_v3  ;;  %v388_v3 = vand.u32 2147483647, %v362_v41  ;;  %vm371_vm8 = vmor %vm369_vm7, %vm370_vm5 }
 0x199   :  { %v366_v60 = vsub.f32 1.0, %v365_v45  ;;  %v391_v45 = vor.u32 1.1754944e-38, %v390_v0 }
 0x19a   :  { %v382_v34 = vmul.f32 %v1722_v63, %v381_v36  ;;  %v373_v36 = vand.u32 2147483647, %v361_v62  ;;  %vm389_vm9 = vcmp.eq.f32.partialorder %v388_v3, 8.507059e+37  ;;  %v3199_v3 = vld [vmem:[#allocation39_spill] sm:$0xff] }
 0x19b   :  { %v367_v31 = vmul.f32 %v1724_v2, %v366_v60  ;;  %v376_v60 = vor.u32 1.1754944e-38, %v375_v30 }
 0x19c   :  { %v1726_v61 = vpop.eup %1725  ;;  %v383_v39 = vadd.f32 %v1722_v63, %v382_v34  ;;  %vm374_vm10 = vcmp.eq.f32.partialorder %v373_v36, 8.507059e+37 }
 0x19d   :  { %v395_v58 = vmul.f32 %v1726_v61, %v363_v1  ;;  %v368_v40 = vadd.f32 %v1724_v2, %v367_v31  ;;  %vm400_vm11 = vweird.f32 %v1726_v61 }
 0x19e   :  { %v387_v42 = vsel %vm386_vm6, %v1722_v63, %v383_v39  ;;  %vm401_vm13 = vmor %vm399_vm12, %vm400_vm11 }
 0x19f   :  { %v396_v37 = vsub.f32 1.0, %v395_v58  ;;  %v372_v35 = vsel %vm371_vm8, %v1724_v2, %v368_v40  ;;  %v392_v34 = vsel %vm389_vm9, %v391_v45, %v387_v42  ;;  %v403_v58 = vand.u32 2147483647, %v363_v1 }
 0x1a0   :  { %v410_v31 = vmul.f32 0.0, %v392_v34  ;;  %v3200_v34 = vld [vmem:[#allocation37_spill] sm:$0xff] }
 0x1a1   :  { %vm404_vm14 = vcmp.eq.f32.partialorder %v403_v58, 8.507059e+37 }
 0x1a6   :  { %v345_v32 = vpop.f32.mrf.mxu1 }
 0x1a7   :  { %v351_v57 = vadd.f32 %v345_v32, %v2408_v59  ;;  %v377_v32 = vsel %vm374_vm10, %v376_v60, %v372_v35  ;;  %v397_v59 = vmul.f32 %v1726_v61, %v396_v37 }
 0x1a9   :  { %1727 = vtanh.f32 %v351_v57  ;;  %v398_v55 = vadd.f32 %v1726_v61, %v397_v59  ;;  %v405_v57 = vand.u32 2147483648, %v363_v1  ;;  %v3197_v1 = vld [vmem:[#allocation29_spill] sm:$0xff]  ;;  %v3198_v59 = vld [vmem:[#allocation36_spill] sm:$0xff] }
 0x1ab   :  { %v402_v62 = vsel %vm401_vm13, %v1726_v61, %v398_v55  ;;  %v406_v63 = vor.u32 1.1754944e-38, %v405_v57  ;;  %v3194_v55 = vld [vmem:[#allocation35_spill] sm:$0xff]  ;;  %v3196_v61 = vld [vmem:[#allocation22_spill] sm:$0xff] }
 0x1ad   :  { %v407_v2 = vsel %vm404_vm14, %v406_v63, %v402_v62 }
 0x1af   :  { %v1728_v29 = vpop.eup %1727 }
 0x1b0   :  { %v411_v56 = vmul.f32 %v1728_v29, %v377_v32  ;;  %v3193_v29 = vld [vmem:[#allocation28_spill] sm:$0xff] }
 0x1b2   :  { %v2411_v41 = vadd.f32 %v411_v56, %v410_v31  ;;  %v3195_v56 = vld [vmem:[#allocation21_spill] sm:$0xff]  ;;  %v3201_v31 = vld [vmem:[#allocation38_spill] sm:$0xff] }
 0x1b4   :  { %1729 = vtanh.f32 %v2411_v41 }
 0x1ba   :  { %v1730_v30 = vpop.eup %1729 }
 0x1bb   :  { %v414_v39 = vmul.f32 %v1730_v30, %v407_v2 }
 0x1bd   :  { %431 = vmatmul.f32.vlgmr.msrb.gmra.mxu2 %v414_v39  ;;  %451 = vmatmul.f32.vlgmr.msrb.gmra.mxu3 %v414_v39 }
 0x1be   :  { %471 = vmatmul.f32.vlgmr.msrb.gmra.mxu0 %v414_v39  ;;  %491 = vmatmul.f32.vlgmr.msra.gmra.mxu1 %v414_v39 }
 0x1bf   :  { %745 = vmatpush.msrb.mxu2 %v2067_v6  ;;  %765 = vmatpush.msrb.mxu3 %v2069_v7  ;;  %v3173_v6 = vld [vmem:[#allocation23_spill] sm:$0xff]  ;;  %v3174_v7 = vld [vmem:[#allocation30_spill] sm:$0xff] }
 0x1c0   :  { %785 = vmatpush.msrb.mxu0 %v2161_v44  ;;  %805 = vmatpush.msra.mxu1 %v2283_v4 }
 0x1c1   :  { %746 = vmatpush.msrb.mxu2 %v2071_v8  ;;  %766 = vmatpush.msrb.mxu3 %v2075_v9  ;;  %v3175_v8 = vld [vmem:[#allocation11_spill] sm:$0xff]  ;;  %v3176_v9 = vld [vmem:[#allocation12_spill] sm:$0xff] }
 0x1c2   :  { %786 = vmatpush.msrb.mxu0 %v2166_v47  ;;  %806 = vmatpush.msra.mxu1 %v2288_v5 }
 0x1c3   :  { %747 = vmatpush.msrb.mxu2 %v2077_v10  ;;  %767 = vmatpush.msrb.mxu3 %v2079_v11  ;;  %v3177_v10 = vld [vmem:[#allocation24_spill] sm:$0xff]  ;;  %v3178_v11 = vld [vmem:[#allocation31_spill] sm:$0xff] }
 0x1c4   :  { %787 = vmatpush.msrb.mxu0 %v2171_v48  ;;  %807 = vmatpush.msra.mxu1 %v2292_v14 }
 0x1c5   :  { %748 = vmatpush.msrb.mxu2 %v2083_v12  ;;  %768 = vmatpush.msrb.mxu3 %v2085_v13  ;;  %v3179_v12 = vld [vmem:[#allocation13_spill] sm:$0xff]  ;;  %v3180_v13 = vld [vmem:[#allocation14_spill] sm:$0xff] }
 0x1c6   :  { %788 = vmatpush.msrb.mxu0 %v2176_v49  ;;  %808 = vmatpush.msra.mxu1 %v2296_v15 }
 0x1c7   :  { %749 = vmatpush.msrb.mxu2 %v2089_v16  ;;  %769 = vmatpush.msrb.mxu3 %v2091_v17  ;;  %v3181_v16 = vld [vmem:[#allocation25_spill] sm:$0xff]  ;;  %v3182_v17 = vld [vmem:[#allocation32_spill] sm:$0xff] }
 0x1c8   :  { %789 = vmatpush.msrb.mxu0 %v2181_v50  ;;  %809 = vmatpush.msra.mxu1 %v2300_v28 }
 0x1c9   :  { %750 = vmatpush.msrb.mxu2 %v2095_v18  ;;  %770 = vmatpush.msrb.mxu3 %v2097_v19  ;;  %v3183_v18 = vld [vmem:[#allocation15_spill] sm:$0xff]  ;;  %v3184_v19 = vld [vmem:[#allocation16_spill] sm:$0xff] }
 0x1ca   :  { %790 = vmatpush.msrb.mxu0 %v2186_v51  ;;  %810 = vmatpush.msra.mxu1 %v2305_v33 }
 0x1cb   :  { %751 = vmatpush.msrb.mxu2 %v2101_v20  ;;  %771 = vmatpush.msrb.mxu3 %v2103_v21  ;;  %v3185_v20 = vld [vmem:[#allocation26_spill] sm:$0xff]  ;;  %v3186_v21 = vld [vmem:[#allocation33_spill] sm:$0xff] }
 0x1cc   :  { %791 = vmatpush.msrb.mxu0 %v2191_v52  ;;  %811 = vmatpush.msra.mxu1 %v2309_v38 }
 0x1cd   :  { %752 = vmatpush.msrb.mxu2 %v2107_v22  ;;  %772 = vmatpush.msrb.mxu3 %v2109_v23  ;;  %v3187_v22 = vld [vmem:[#allocation17_spill] sm:$0xff]  ;;  %v3188_v23 = vld [vmem:[#allocation18_spill] sm:$0xff] }
 0x1ce   :  { %792 = vmatpush.msrb.mxu0 %v2196_v53  ;;  %812 = vmatpush.msra.mxu1 %v2313_v43 }
 0x1cf   :  { %753 = vmatpush.msrb.mxu2 %v2113_v24  ;;  %773 = vmatpush.msrb.mxu3 %v2115_v25  ;;  %v3189_v24 = vld [vmem:[#allocation27_spill] sm:$0xff]  ;;  %v3190_v25 = vld [vmem:[#allocation34_spill] sm:$0xff] }
 0x1d0   :  { %793 = vmatpush.msrb.mxu0 %v2201_v54  ;;  %813 = vmatpush.msra.mxu1 %v2317_v46 }
 0x1d1   :  { %754 = vmatpush.msrb.mxu2 %v2119_v26  ;;  %774 = vmatpush.msrb.mxu3 %v2121_v27  ;;  %v3191_v26 = vld [vmem:[#allocation19_spill] sm:$0xff]  ;;  %v3192_v27 = vld [vmem:[#allocation20_spill] sm:$0xff] }
 0x1d2   :  { %794 = vmatpush.msrb.mxu0 %v3173_v6  ;;  %814 = vmatpush.msra.mxu1 %v3174_v7 }
 0x1d3   :  { %755 = vmatpush.msrb.mxu2 %v3175_v8  ;;  %775 = vmatpush.msrb.mxu3 %v3176_v9 }
 0x1d4   :  { %795 = vmatpush.msrb.mxu0 %v3177_v10  ;;  %815 = vmatpush.msra.mxu1 %v3178_v11 }
 0x1d5   :  { %756 = vmatpush.msrb.mxu2 %v3179_v12  ;;  %776 = vmatpush.msrb.mxu3 %v3180_v13 }
 0x1d6   :  { %796 = vmatpush.msrb.mxu0 %v3181_v16  ;;  %816 = vmatpush.msra.mxu1 %v3182_v17 }
 0x1d7   :  { %757 = vmatpush.msrb.mxu2 %v3183_v18  ;;  %777 = vmatpush.msrb.mxu3 %v3184_v19 }
 0x1d8   :  { %797 = vmatpush.msrb.mxu0 %v3185_v20  ;;  %817 = vmatpush.msra.mxu1 %v3186_v21 }
 0x1d9   :  { %758 = vmatpush.msrb.mxu2 %v3187_v22  ;;  %778 = vmatpush.msrb.mxu3 %v3188_v23  ;;  %v3202_v22 = vld [vmem:[#allocation40_spill] sm:$0xff] }
 0x1da   :  { %798 = vmatpush.msrb.mxu0 %v3189_v24  ;;  %818 = vmatpush.msra.mxu1 %v3190_v25 }
 0x1db   :  { %759 = vmatpush.msrb.mxu2 %v3191_v26  ;;  %779 = vmatpush.msrb.mxu3 %v3192_v27 }
 0x1dc   :  { %799 = vmatpush.msrb.mxu0 %v3193_v29  ;;  %819 = vmatpush.msra.mxu1 %v3194_v55 }
 0x1dd   :  { %760 = vmatpush.msrb.mxu2 %v3195_v56  ;;  %780 = vmatpush.msrb.mxu3 %v3196_v61 }
 0x1de   :  { %800 = vmatpush.msrb.mxu0 %v3197_v1  ;;  %820 = vmatpush.msra.mxu1 %v3198_v59 }
 0x23b   :  { %v472_v0 = vpop.f32.mrf.mxu0  ;;  %v492_v9 = vpop.f32.mrf.mxu1 }
 0x23c   :  { %v501_v40 = vrot.slane %v472_v0, 7  ;;  %v502_v13 = vrot.slane %v492_v9, 7  ;;  %v570_v9 = vrot.slane %v2411_v41, 7 }
 0x23e   :  { %v509_v36 = vadd.f32 %v501_v40, %v3199_v3  ;;  %v510_v23 = vadd.f32 %v502_v13, %v3202_v22 }
 0x240   :  { %v1688_v42 = vmul.f32 -1.442695, %v509_v36  ;;  %v432_v45 = vpop.f32.mrf.mxu2  ;;  %v452_v37 = vpop.f32.mrf.mxu3 }
 0x241   :  { %v499_v35 = vrot.slane %v432_v45, 7  ;;  %v500_v60 = vrot.slane %v452_v37, 7 }
 0x242   :  { %1731 = vpow2.f32 %v1688_v42 }
 0x243   :  { %v507_v32 = vadd.f32 %v499_v35, %v3200_v34  ;;  %v508_v57 = vadd.f32 %v500_v60, %v3201_v31 }
 0x245   :  { %v1686_v58 = vmul.f32 -1.442695, %v507_v32  ;;  %v1687_v62 = vmul.f32 -1.442695, %v508_v57 }
 0x247   :  { %1733 = vpow2.f32 %v1686_v58 }
 0x248   :  { %v1732_v63 = vpop.eup %1731  ;;  %1735 = vpow2.f32 %v1687_v62 }
 0x249   :  { %v522_v30 = vadd.f32 1.0, %v1732_v63 }
 0x24b   :  { %1737 = vrcp.f32 %v522_v30  ;;  %vm558_vm8 = vweird.f32 %v522_v30 }
 0x24d   :  { %v1734_v2 = vpop.eup %1733 }
 0x24e   :  { %v1736_v39 = vpop.eup %1735  ;;  %v520_v8 = vadd.f32 1.0, %v1734_v2 }
 0x24f   :  { %v521_v12 = vadd.f32 1.0, %v1736_v39 }
 0x250   :  { %1739 = vrcp.f32 %v520_v8  ;;  %v534_v40 = vand.u32 2147483648, %v520_v8  ;;  %v532_v45 = vand.u32 2147483647, %v520_v8  ;;  %vm528_vm1 = vweird.f32 %v520_v8 }
 0x251   :  { %1741 = vrcp.f32 %v521_v12  ;;  %v1738_v18 = vpop.eup %1737  ;;  %v549_v37 = vand.u32 2147483648, %v521_v12  ;;  %v547_v60 = vand.u32 2147483647, %v521_v12  ;;  %vm543_vm3 = vweird.f32 %v521_v12 }
 0x252   :  { %v554_v61 = vmul.f32 %v1738_v18, %v522_v30  ;;  %1743 = vtanh.f32 %v510_v23  ;;  %v535_v58 = vor.u32 1.1754944e-38, %v534_v40  ;;  %vm533_vm4 = vcmp.eq.f32.partialorder %v532_v45, 8.507059e+37 }
 0x253   :  { %v550_v2 = vor.u32 1.1754944e-38, %v549_v37  ;;  %vm548_vm6 = vcmp.eq.f32.partialorder %v547_v60, 8.507059e+37  ;;  %vm559_vm7 = vweird.f32 %v1738_v18  ;;  %v564_v40 = vand.u32 2147483648, %v522_v30  ;;  %v2489_v60 = vld [vmem:[#allocation5 + $0x1e8] sm:$0xff] }
 0x254   :  { %v555_v32 = vsub.f32 1.0, %v554_v61  ;;  %vm560_vm9 = vmor %vm558_vm8, %vm559_vm7 }
 0x256   :  { %v1740_v19 = vpop.eup %1739 }
 0x257   :  { %v1742_v26 = vpop.eup %1741  ;;  %v524_v27 = vmul.f32 %v1740_v19, %v520_v8  ;;  %vm529_vm15 = vweird.f32 %v1740_v19 }
 0x258   :  { %v539_v56 = vmul.f32 %v1742_v26, %v521_v12  ;;  %vm544_vm0 = vweird.f32 %v1742_v26  ;;  %vm530_vm2 = vmor %vm528_vm1, %vm529_vm15  ;;  %v1744_v39 = vpop.eup %1743  ;;  %v562_v12 = vand.u32 2147483647, %v522_v30  ;;  %v2494_v30 = vld [vmem:[#allocation5 + $0x1c0] sm:$0xff] }
 0x259   :  { %v525_v0 = vsub.f32 1.0, %v524_v27  ;;  %vm545_vm5 = vmor %vm543_vm3, %vm544_vm0 }
 0x25a   :  { %v540_v36 = vsub.f32 1.0, %v539_v56  ;;  %v556_v56 = vmul.f32 %v1738_v18, %v555_v32  ;;  %vm563_vm10 = vcmp.eq.f32.partialorder %v562_v12, 8.507059e+37  ;;  %v2502_v32 = vld [vmem:[#allocation5 + $0x1a0] sm:$0xff] }
 0x25b   :  { %v526_v42 = vmul.f32 %v1740_v19, %v525_v0 }
 0x25c   :  { %v541_v35 = vmul.f32 %v1742_v26, %v540_v36  ;;  %v557_v8 = vadd.f32 %v1738_v18, %v556_v56  ;;  %v2585_v56 = vld [vmem:[#allocation5 + $0x68] sm:$0xff] }
 0x25d   :  { %v527_v57 = vadd.f32 %v1740_v19, %v526_v42  ;;  %v565_v42 = vor.u32 1.1754944e-38, %v564_v40  ;;  %3209 = vst [vmem:[#allocation13_spill] sm:$0xff] %v2585_v56 }
 0x25e   :  { %v542_v62 = vadd.f32 %v1742_v26, %v541_v35  ;;  %v2486_v35 = vld [vmem:[#allocation5 + $0x1e0] sm:$0xff] }
 0x25f   :  { %v531_v63 = vsel %vm530_vm2, %v1740_v19, %v527_v57  ;;  %v561_v19 = vsel %vm560_vm9, %v1738_v18, %v557_v8  ;;  %v2497_v18 = vld [vmem:[#allocation5 + $0x1c8] sm:$0xff] }
 0x260   :  { %v546_v13 = vsel %vm545_vm5, %v1742_v26, %v542_v62  ;;  %v536_v23 = vsel %vm533_vm4, %v535_v58, %v531_v63  ;;  %v566_v26 = vsel %vm563_vm10, %v565_v42, %v561_v19  ;;  %v2505_v57 = vld [vmem:[#allocation5 + $0x1a8] sm:$0xff] }
 0x261   :  { %v551_v27 = vsel %vm548_vm6, %v550_v2, %v546_v13  ;;  %v573_v0 = vmul.f32 %v1744_v39, %v536_v23  ;;  %v2513_v58 = vld [vmem:[#allocation5 + $0x188] sm:$0xff] }
 0x262   :  { %v572_v61 = vmul.f32 %v570_v9, %v551_v27  ;;  %v2521_v62 = vld [vmem:[#allocation5 + $0x168] sm:$0xff] }
 0x263   :  { %v2529_v63 = vld [vmem:[#allocation5 + $0x148] sm:$0xff] }
 0x264   :  { %v2483_v36 = vadd.f32 %v573_v0, %v572_v61  ;;  %v2537_v2 = vld [vmem:[#allocation5 + $0x128] sm:$0xff] }
 0x265   :  { %v2545_v39 = vld [vmem:[#allocation5 + $0x108] sm:$0xff] }
 0x266   :  { %1745 = vtanh.f32 %v2483_v36  ;;  %v2553_v9 = vld [vmem:[#allocation5 + $0xe8] sm:$0xff] }
 0x267   :  { %v2561_v13 = vld [vmem:[#allocation5 + $0xc8] sm:$0xff] }
 0x268   :  { %3203 = vst [vmem:[#allocation23_spill] sm:$0xff] %v2561_v13  ;;  %v2569_v23 = vld [vmem:[#allocation5 + $0xa8] sm:$0xff] }
 0x269   :  { %3205 = vst [vmem:[#allocation11_spill] sm:$0xff] %v2569_v23  ;;  %v2577_v27 = vld [vmem:[#allocation5 + $0x88] sm:$0xff] }
 0x26a   :  { %3207 = vst [vmem:[#allocation24_spill] sm:$0xff] %v2577_v27  ;;  %v2593_v0 = vld [vmem:[#allocation5 + $0x48] sm:$0xff] }
 0x26b   :  { %3211 = vst [vmem:[#allocation25_spill] sm:$0xff] %v2593_v0  ;;  %v2601_v61 = vld [vmem:[#allocation5 + $0x28] sm:$0xff] }
 0x26c   :  { %v1746_v41 = vpop.eup %1745  ;;  %3213 = vst [vmem:[#allocation15_spill] sm:$0xff] %v2601_v61  ;;  %v2609_v8 = vld [vmem:[#allocation5 + $0x8] sm:$0xff] }
 0x26d   :  { %v576_v45 = vmul.f32 %v1746_v41, %v566_v26  ;;  %3215 = vst [vmem:[#allocation26_spill] sm:$0xff] %v2609_v8 }
 0x26f   :  { %v578_v37 = vrot.slane %v576_v45, 1 }
 0x271   :  { %596 = vmatmul.f32.vlgmr.msra.gmra.mxu2 %v578_v37  ;;  %616 = vmatmul.f32.vlgmr.msra.gmra.mxu3 %v578_v37 }
 0x272   :  { %636 = vmatmul.f32.vlgmr.msra.gmra.mxu0 %v578_v37  ;;  %656 = vmatmul.f32.vlgmr.msrb.gmra.mxu1 %v578_v37 }
 0x273   :  { %910 = vmatpush.msra.mxu2 %v2486_v35  ;;  %930 = vmatpush.msra.mxu3 %v2489_v60 }
 0x274   :  { %950 = vmatpush.msra.mxu0 %v2161_v44  ;;  %970 = vmatpush.msrb.mxu1 %v2283_v4  ;;  %v2510_v44 = vld [vmem:[#allocation5 + $0x180] sm:$0xff] }
 0x275   :  { %911 = vmatpush.msra.mxu2 %v2494_v30  ;;  %931 = vmatpush.msra.mxu3 %v2497_v18 }
 0x276   :  { %951 = vmatpush.msra.mxu0 %v2166_v47  ;;  %971 = vmatpush.msrb.mxu1 %v2288_v5  ;;  %v2518_v47 = vld [vmem:[#allocation5 + $0x160] sm:$0xff] }
 0x277   :  { %912 = vmatpush.msra.mxu2 %v2502_v32  ;;  %932 = vmatpush.msra.mxu3 %v2505_v57 }
 0x278   :  { %952 = vmatpush.msra.mxu0 %v2171_v48  ;;  %972 = vmatpush.msrb.mxu1 %v2292_v14  ;;  %v2526_v48 = vld [vmem:[#allocation5 + $0x140] sm:$0xff] }
 0x279   :  { %913 = vmatpush.msra.mxu2 %v2510_v44  ;;  %933 = vmatpush.msra.mxu3 %v2513_v58 }
 0x27a   :  { %953 = vmatpush.msra.mxu0 %v2176_v49  ;;  %973 = vmatpush.msrb.mxu1 %v2296_v15  ;;  %v2534_v49 = vld [vmem:[#allocation5 + $0x120] sm:$0xff] }
 0x27b   :  { %914 = vmatpush.msra.mxu2 %v2518_v47  ;;  %934 = vmatpush.msra.mxu3 %v2521_v62 }
 0x27c   :  { %954 = vmatpush.msra.mxu0 %v2181_v50  ;;  %974 = vmatpush.msrb.mxu1 %v2300_v28  ;;  %v2542_v50 = vld [vmem:[#allocation5 + $0x100] sm:$0xff] }
 0x27d   :  { %915 = vmatpush.msra.mxu2 %v2526_v48  ;;  %935 = vmatpush.msra.mxu3 %v2529_v63 }
 0x27e   :  { %955 = vmatpush.msra.mxu0 %v2186_v51  ;;  %975 = vmatpush.msrb.mxu1 %v2305_v33  ;;  %v2550_v51 = vld [vmem:[#allocation5 + $0xe0] sm:$0xff] }
 0x27f   :  { %916 = vmatpush.msra.mxu2 %v2534_v49  ;;  %936 = vmatpush.msra.mxu3 %v2537_v2 }
 0x280   :  { %956 = vmatpush.msra.mxu0 %v2191_v52  ;;  %976 = vmatpush.msrb.mxu1 %v2309_v38  ;;  %v2558_v52 = vld [vmem:[#allocation5 + $0xc0] sm:$0xff] }
 0x281   :  { %917 = vmatpush.msra.mxu2 %v2542_v50  ;;  %937 = vmatpush.msra.mxu3 %v2545_v39 }
 0x282   :  { %957 = vmatpush.msra.mxu0 %v2196_v53  ;;  %977 = vmatpush.msrb.mxu1 %v2313_v43  ;;  %v2566_v53 = vld [vmem:[#allocation5 + $0xa0] sm:$0xff] }
 0x283   :  { %918 = vmatpush.msra.mxu2 %v2550_v51  ;;  %938 = vmatpush.msra.mxu3 %v2553_v9  ;;  %3204 = vst [vmem:[#allocation30_spill] sm:$0xff] %v2566_v53 }
 0x284   :  { %958 = vmatpush.msra.mxu0 %v2201_v54  ;;  %978 = vmatpush.msrb.mxu1 %v2317_v46  ;;  %v2574_v54 = vld [vmem:[#allocation5 + $0x80] sm:$0xff] }
 0x285   :  { %919 = vmatpush.msra.mxu2 %v2558_v52  ;;  %939 = vmatpush.msra.mxu3 %v2561_v13  ;;  %3206 = vst [vmem:[#allocation12_spill] sm:$0xff] %v2574_v54 }
 0x286   :  { %959 = vmatpush.msra.mxu0 %v3173_v6  ;;  %979 = vmatpush.msrb.mxu1 %v3174_v7  ;;  %v2582_v6 = vld [vmem:[#allocation5 + $0x60] sm:$0xff] }
 0x287   :  { %920 = vmatpush.msra.mxu2 %v2566_v53  ;;  %940 = vmatpush.msra.mxu3 %v2569_v23  ;;  %3208 = vst [vmem:[#allocation31_spill] sm:$0xff] %v2582_v6 }
 0x288   :  { %960 = vmatpush.msra.mxu0 %v3177_v10  ;;  %980 = vmatpush.msrb.mxu1 %v3178_v11  ;;  %v2590_v10 = vld [vmem:[#allocation5 + $0x40] sm:$0xff] }
 0x289   :  { %921 = vmatpush.msra.mxu2 %v2574_v54  ;;  %941 = vmatpush.msra.mxu3 %v2577_v27  ;;  %3210 = vst [vmem:[#allocation14_spill] sm:$0xff] %v2590_v10 }
 0x28a   :  { %961 = vmatpush.msra.mxu0 %v3181_v16  ;;  %981 = vmatpush.msrb.mxu1 %v3182_v17  ;;  %v2598_v16 = vld [vmem:[#allocation5 + $0x20] sm:$0xff] }
 0x28b   :  { %922 = vmatpush.msra.mxu2 %v2582_v6  ;;  %942 = vmatpush.msra.mxu3 %v2585_v56  ;;  %3212 = vst [vmem:[#allocation32_spill] sm:$0xff] %v2598_v16 }
 0x28c   :  { %962 = vmatpush.msra.mxu0 %v3185_v20  ;;  %982 = vmatpush.msrb.mxu1 %v3186_v21  ;;  %v2606_v20 = vld [vmem:[#allocation5] sm:$0xff] }
 0x28d   :  { %923 = vmatpush.msra.mxu2 %v2590_v10  ;;  %943 = vmatpush.msra.mxu3 %v2593_v0  ;;  %3214 = vst [vmem:[#allocation16_spill] sm:$0xff] %v2606_v20 }
 0x28e   :  { %963 = vmatpush.msra.mxu0 %v3189_v24  ;;  %983 = vmatpush.msrb.mxu1 %v3190_v25 }
 0x28f   :  { %924 = vmatpush.msra.mxu2 %v2598_v16  ;;  %944 = vmatpush.msra.mxu3 %v2601_v61 }
 0x290   :  { %964 = vmatpush.msra.mxu0 %v3193_v29  ;;  %984 = vmatpush.msrb.mxu1 %v3194_v55 }
 0x291   :  { %925 = vmatpush.msra.mxu2 %v2606_v20  ;;  %945 = vmatpush.msra.mxu3 %v2609_v8 }
 0x292   :  { %965 = vmatpush.msra.mxu0 %v3197_v1  ;;  %985 = vmatpush.msrb.mxu1 %v3198_v59 }
 0x2ef   :  { %v637_v24 = vpop.f32.mrf.mxu0 }
 0x2f0   :  { %v666_v40 = vrot.slane %v637_v24, 6 }
 0x2f2   :  { %v674_v12 = vadd.f32 %v666_v40, %v3199_v3  ;;  %v657_v40 = vpop.f32.mrf.mxu1 }
 0x2f4   :  { %v1691_v19 = vmul.f32 -1.442695, %v674_v12  ;;  %v597_v29 = vpop.f32.mrf.mxu2  ;;  %v617_v42 = vpop.f32.mrf.mxu3 }
 0x2f5   :  { %v664_v41 = vrot.slane %v597_v29, 6  ;;  %v665_v26 = vrot.slane %v617_v42, 6  ;;  %v667_v29 = vrot.slane %v657_v40, 6 }
 0x2f6   :  { %1747 = vpow2.f32 %v1691_v19 }
 0x2f7   :  { %v672_v45 = vadd.f32 %v664_v41, %v3200_v34  ;;  %v673_v37 = vadd.f32 %v665_v26, %v3201_v31  ;;  %v675_v41 = vadd.f32 %v667_v29, %v3202_v22 }
 0x2f9   :  { %v1689_v20 = vmul.f32 -1.442695, %v672_v45  ;;  %v1690_v8 = vmul.f32 -1.442695, %v673_v37 }
 0x2fb   :  { %1749 = vpow2.f32 %v1689_v20 }
 0x2fc   :  { %v1748_v1 = vpop.eup %1747  ;;  %1751 = vpow2.f32 %v1690_v8 }
 0x2fd   :  { %v687_v59 = vadd.f32 1.0, %v1748_v1 }
 0x2ff   :  { %1753 = vrcp.f32 %v687_v59  ;;  %vm723_vm4 = vweird.f32 %v687_v59 }
 0x301   :  { %v1750_v55 = vpop.eup %1749 }
 0x302   :  { %v1752_v24 = vpop.eup %1751  ;;  %v685_v61 = vadd.f32 1.0, %v1750_v55 }
 0x303   :  { %v686_v12 = vadd.f32 1.0, %v1752_v24 }
 0x304   :  { %1755 = vrcp.f32 %v685_v61  ;;  %v699_v8 = vand.u32 2147483648, %v685_v61  ;;  %v697_v55 = vand.u32 2147483647, %v685_v61  ;;  %vm693_vm13 = vweird.f32 %v685_v61 }
 0x305   :  { %1757 = vrcp.f32 %v686_v12  ;;  %v1754_v19 = vpop.eup %1753  ;;  %v714_v3 = vand.u32 2147483648, %v686_v12  ;;  %v712_v16 = vand.u32 2147483647, %v686_v12  ;;  %vm708_vm15 = vweird.f32 %v686_v12 }
 0x306   :  { %v719_v20 = vmul.f32 %v1754_v19, %v687_v59  ;;  %1759 = vtanh.f32 %v675_v41  ;;  %v700_v29 = vor.u32 1.1754944e-38, %v699_v8  ;;  %vm698_vm0 = vcmp.eq.f32.partialorder %v697_v55, 8.507059e+37  ;;  %v3225_v55 = vld [vmem:[#allocation34_spill] sm:$0xff] }
 0x307   :  { %v715_v41 = vor.u32 1.1754944e-38, %v714_v3  ;;  %vm713_vm2 = vcmp.eq.f32.partialorder %v712_v16, 8.507059e+37  ;;  %vm724_vm3 = vweird.f32 %v1754_v19  ;;  %v729_v8 = vand.u32 2147483648, %v687_v59 }
 0x308   :  { %v720_v40 = vsub.f32 1.0, %v719_v20  ;;  %vm725_vm5 = vmor %vm723_vm4, %vm724_vm3 }
 0x30a   :  { %v1756_v42 = vpop.eup %1755  ;;  %v721_v21 = vmul.f32 %v1754_v19, %v720_v40  ;;  %v2708_v40 = vld [vmem:[#allocation5 + $0x30] sm:$0xff] }
 0x30b   :  { %v1758_v26 = vpop.eup %1757  ;;  %v689_v45 = vmul.f32 %v1756_v42, %v685_v61  ;;  %vm694_vm11 = vweird.f32 %v1756_v42  ;;  %3228 = vst [vmem:[#allocation28_spill] sm:$0xff] %v2708_v40 }
 0x30c   :  { %v704_v37 = vmul.f32 %v1758_v26, %v686_v12  ;;  %vm709_vm12 = vweird.f32 %v1758_v26  ;;  %vm695_vm14 = vmor %vm693_vm13, %vm694_vm11  ;;  %v722_v61 = vadd.f32 %v1754_v19, %v721_v21  ;;  %v730_v12 = vor.u32 1.1754944e-38, %v729_v8  ;;  %v2624_v21 = vld [vmem:[#allocation5 + $0x1f0] sm:$0xff] }
 0x30d   :  { %v690_v31 = vsub.f32 1.0, %v689_v45  ;;  %vm710_vm1 = vmor %vm708_vm15, %vm709_vm12  ;;  %v1760_v45 = vpop.eup %1759 }
 0x30e   :  { %v705_v1 = vsub.f32 1.0, %v704_v37  ;;  %v726_v3 = vsel %vm725_vm5, %v1754_v19, %v722_v61  ;;  %v3221_v19 = vld [vmem:[#allocation33_spill] sm:$0xff]  ;;  %v3234_v61 = vld [vmem:[#allocation39_spill] sm:$0xff] }
 0x30f   :  { %v691_v34 = vmul.f32 %v1756_v42, %v690_v31  ;;  %v735_v31 = vrot.slane %v2483_v36, 7 }
 0x310   :  { %v706_v24 = vmul.f32 %v1758_v26, %v705_v1 }
 0x311   :  { %v692_v25 = vadd.f32 %v1756_v42, %v691_v34 }
 0x312   :  { %v707_v22 = vadd.f32 %v1758_v26, %v706_v24  ;;  %v3227_v24 = vld [vmem:[#allocation15_spill] sm:$0xff] }
 0x313   :  { %v696_v0 = vsel %vm695_vm14, %v1756_v42, %v692_v25  ;;  %v727_v25 = vand.u32 2147483647, %v687_v59  ;;  %v2630_v59 = vld [vmem:[#allocation5 + $0x1d0] sm:$0xff] }
 0x314   :  { %v711_v37 = vsel %vm710_vm1, %v1758_v26, %v707_v22  ;;  %v701_v10 = vsel %vm698_vm0, %v700_v29, %v696_v0  ;;  %v3223_v42 = vld [vmem:[#allocation25_spill] sm:$0xff]  ;;  %v3229_v29 = vld [vmem:[#allocation35_spill] sm:$0xff] }
 0x315   :  { %v716_v1 = vsel %vm713_vm2, %v715_v41, %v711_v37  ;;  %v738_v56 = vmul.f32 %v1760_v45, %v701_v10  ;;  %vm728_vm6 = vcmp.eq.f32.partialorder %v727_v25, 8.507059e+37  ;;  %v2696_v10 = vld [vmem:[#allocation5 + $0x70] sm:$0xff]  ;;  %v3231_v45 = vld [vmem:[#allocation26_spill] sm:$0xff] }
 0x316   :  { %v737_v20 = vmul.f32 %v735_v31, %v716_v1  ;;  %v731_v36 = vsel %vm728_vm6, %v730_v12, %v726_v3  ;;  %3220 = vst [vmem:[#allocation19_spill] sm:$0xff] %v2696_v10  ;;  %v2702_v26 = vld [vmem:[#allocation5 + $0x50] sm:$0xff] }
 0x317   :  { %3224 = vst [vmem:[#allocation20_spill] sm:$0xff] %v2702_v26  ;;  %v3230_v41 = vld [vmem:[#allocation16_spill] sm:$0xff] }
 0x318   :  { %v2619_v34 = vadd.f32 %v738_v56, %v737_v20  ;;  %v2636_v56 = vld [vmem:[#allocation5 + $0x1b0] sm:$0xff] }
 0x319   :  { %v2714_v31 = vld [vmem:[#allocation5 + $0x10] sm:$0xff] }
 0x31a   :  { %1761 = vtanh.f32 %v2619_v34  ;;  %3232 = vst [vmem:[#allocation21_spill] sm:$0xff] %v2714_v31  ;;  %v3233_v37 = vld [vmem:[#allocation36_spill] sm:$0xff] }
 0x320   :  { %v1762_v22 = vpop.eup %1761 }
 0x321   :  { %v741_v0 = vmul.f32 %v1762_v22, %v731_v36 }
 0x323   :  { %v743_v16 = vrot.slane %v741_v0, 2  ;;  %v3235_v0 = vld [vmem:[#allocation37_spill] sm:$0xff] }
 0x325   :  { %761 = vmatmul.f32.vlgmr.msrb.gmra.mxu2 %v743_v16  ;;  %781 = vmatmul.f32.vlgmr.msrb.gmra.mxu3 %v743_v16 }
 0x326   :  { %801 = vmatmul.f32.vlgmr.msrb.gmra.mxu0 %v743_v16  ;;  %821 = vmatmul.f32.vlgmr.msra.gmra.mxu1 %v743_v16 }
 0x327   :  { %1075 = vmatpush.msrb.mxu2 %v2486_v35  ;;  %1095 = vmatpush.msrb.mxu3 %v2489_v60 }
 0x328   :  { %1115 = vmatpush.msrb.mxu0 %v2624_v21  ;;  %1135 = vmatpush.msra.mxu1 %v2283_v4  ;;  %v2642_v4 = vld [vmem:[#allocation5 + $0x190] sm:$0xff] }
 0x329   :  { %1076 = vmatpush.msrb.mxu2 %v2494_v30  ;;  %1096 = vmatpush.msrb.mxu3 %v2497_v18 }
 0x32a   :  { %1116 = vmatpush.msrb.mxu0 %v2630_v59  ;;  %1136 = vmatpush.msra.mxu1 %v2288_v5  ;;  %v2648_v5 = vld [vmem:[#allocation5 + $0x170] sm:$0xff] }
 0x32b   :  { %1077 = vmatpush.msrb.mxu2 %v2502_v32  ;;  %1097 = vmatpush.msrb.mxu3 %v2505_v57 }
 0x32c   :  { %1117 = vmatpush.msrb.mxu0 %v2636_v56  ;;  %1137 = vmatpush.msra.mxu1 %v2292_v14  ;;  %v2654_v14 = vld [vmem:[#allocation5 + $0x150] sm:$0xff] }
 0x32d   :  { %1078 = vmatpush.msrb.mxu2 %v2510_v44  ;;  %1098 = vmatpush.msrb.mxu3 %v2513_v58 }
 0x32e   :  { %1118 = vmatpush.msrb.mxu0 %v2642_v4  ;;  %1138 = vmatpush.msra.mxu1 %v2296_v15  ;;  %v2660_v15 = vld [vmem:[#allocation5 + $0x130] sm:$0xff] }
 0x32f   :  { %1079 = vmatpush.msrb.mxu2 %v2518_v47  ;;  %1099 = vmatpush.msrb.mxu3 %v2521_v62 }
 0x330   :  { %1119 = vmatpush.msrb.mxu0 %v2648_v5  ;;  %1139 = vmatpush.msra.mxu1 %v2300_v28  ;;  %v2666_v28 = vld [vmem:[#allocation5 + $0x110] sm:$0xff] }
 0x331   :  { %1080 = vmatpush.msrb.mxu2 %v2526_v48  ;;  %1100 = vmatpush.msrb.mxu3 %v2529_v63 }
 0x332   :  { %1120 = vmatpush.msrb.mxu0 %v2654_v14  ;;  %1140 = vmatpush.msra.mxu1 %v2305_v33  ;;  %v2672_v33 = vld [vmem:[#allocation5 + $0xf0] sm:$0xff] }
 0x333   :  { %1081 = vmatpush.msrb.mxu2 %v2534_v49  ;;  %1101 = vmatpush.msrb.mxu3 %v2537_v2 }
 0x334   :  { %1121 = vmatpush.msrb.mxu0 %v2660_v15  ;;  %1141 = vmatpush.msra.mxu1 %v2309_v38  ;;  %v2678_v38 = vld [vmem:[#allocation5 + $0xd0] sm:$0xff] }
 0x335   :  { %1082 = vmatpush.msrb.mxu2 %v2542_v50  ;;  %1102 = vmatpush.msrb.mxu3 %v2545_v39  ;;  %3216 = vst [vmem:[#allocation17_spill] sm:$0xff] %v2678_v38 }
 0x336   :  { %1122 = vmatpush.msrb.mxu0 %v2666_v28  ;;  %1142 = vmatpush.msra.mxu1 %v2313_v43  ;;  %v2684_v43 = vld [vmem:[#allocation5 + $0xb0] sm:$0xff] }
 0x337   :  { %1083 = vmatpush.msrb.mxu2 %v2550_v51  ;;  %1103 = vmatpush.msrb.mxu3 %v2553_v9  ;;  %3217 = vst [vmem:[#allocation18_spill] sm:$0xff] %v2684_v43 }
 0x338   :  { %1123 = vmatpush.msrb.mxu0 %v2672_v33  ;;  %1143 = vmatpush.msra.mxu1 %v2317_v46  ;;  %v2690_v46 = vld [vmem:[#allocation5 + $0x90] sm:$0xff] }
 0x339   :  { %1084 = vmatpush.msrb.mxu2 %v2558_v52  ;;  %1104 = vmatpush.msrb.mxu3 %v2561_v13  ;;  %3218 = vst [vmem:[#allocation27_spill] sm:$0xff] %v2690_v46 }
 0x33a   :  { %1124 = vmatpush.msrb.mxu0 %v2678_v38  ;;  %1144 = vmatpush.msra.mxu1 %v3174_v7  ;;  %v3219_v7 = vld [vmem:[#allocation13_spill] sm:$0xff] }
 0x33b   :  { %1085 = vmatpush.msrb.mxu2 %v2566_v53  ;;  %1105 = vmatpush.msrb.mxu3 %v2569_v23 }
 0x33c   :  { %1125 = vmatpush.msrb.mxu0 %v2684_v43  ;;  %1145 = vmatpush.msra.mxu1 %v3178_v11  ;;  %v3222_v11 = vld [vmem:[#allocation14_spill] sm:$0xff] }
 0x33d   :  { %1086 = vmatpush.msrb.mxu2 %v2574_v54  ;;  %1106 = vmatpush.msrb.mxu3 %v2577_v27 }
 0x33e   :  { %1126 = vmatpush.msrb.mxu0 %v2690_v46  ;;  %1146 = vmatpush.msra.mxu1 %v3182_v17  ;;  %v3226_v17 = vld [vmem:[#allocation32_spill] sm:$0xff] }
 0x33f   :  { %1087 = vmatpush.msrb.mxu2 %v2582_v6  ;;  %1107 = vmatpush.msrb.mxu3 %v3219_v7 }
 0x340   :  { %1127 = vmatpush.msrb.mxu0 %v2696_v10  ;;  %1147 = vmatpush.msra.mxu1 %v3221_v19  ;;  %v3236_v19 = vld [vmem:[#allocation38_spill] sm:$0xff] }
 0x341   :  { %1088 = vmatpush.msrb.mxu2 %v3222_v11  ;;  %1108 = vmatpush.msrb.mxu3 %v3223_v42 }
 0x342   :  { %1128 = vmatpush.msrb.mxu0 %v2702_v26  ;;  %1148 = vmatpush.msra.mxu1 %v3225_v55 }
 0x343   :  { %1089 = vmatpush.msrb.mxu2 %v3226_v17  ;;  %1109 = vmatpush.msrb.mxu3 %v3227_v24 }
 0x344   :  { %1129 = vmatpush.msrb.mxu0 %v2708_v40  ;;  %1149 = vmatpush.msra.mxu1 %v3229_v29 }
 0x345   :  { %1090 = vmatpush.msrb.mxu2 %v3230_v41  ;;  %1110 = vmatpush.msrb.mxu3 %v3231_v45 }
 0x346   :  { %1130 = vmatpush.msrb.mxu0 %v2714_v31  ;;  %1150 = vmatpush.msra.mxu1 %v3233_v37 }
 0x3a3   :  { %v802_v1 = vpop.f32.mrf.mxu0 }
 0x3a4   :  { %v831_v20 = vrot.slane %v802_v1, 5 }
 0x3a6   :  { %v839_v8 = vadd.f32 %v831_v20, %v3234_v61  ;;  %v822_v20 = vpop.f32.mrf.mxu1 }
 0x3a8   :  { %v1694_v25 = vmul.f32 -1.442695, %v839_v8  ;;  %v762_v3 = vpop.f32.mrf.mxu2  ;;  %v782_v12 = vpop.f32.mrf.mxu3 }
 0x3a9   :  { %v829_v22 = vrot.slane %v762_v3, 5  ;;  %v830_v36 = vrot.slane %v782_v12, 5  ;;  %v832_v3 = vrot.slane %v822_v20, 5 }
 0x3aa   :  { %1763 = vpow2.f32 %v1694_v25 }
 0x3ab   :  { %v837_v16 = vadd.f32 %v829_v22, %v3235_v0  ;;  %v838_v55 = vadd.f32 %v830_v36, %v3236_v19  ;;  %v3237_v22 = vld [vmem:[#allocation40_spill] sm:$0xff] }
 0x3ac   :  { %v840_v0 = vadd.f32 %v832_v3, %v3237_v22 }
 0x3ad   :  { %v1692_v29 = vmul.f32 -1.442695, %v837_v16  ;;  %v1693_v45 = vmul.f32 -1.442695, %v838_v55 }
 0x3af   :  { %1765 = vpow2.f32 %v1692_v29 }
 0x3b0   :  { %v1764_v31 = vpop.eup %1763  ;;  %1767 = vpow2.f32 %v1693_v45 }
 0x3b1   :  { %v852_v37 = vadd.f32 1.0, %v1764_v31 }
 0x3b3   :  { %1769 = vrcp.f32 %v852_v37  ;;  %vm888_vm0 = vweird.f32 %v852_v37 }
 0x3b5   :  { %v1766_v41 = vpop.eup %1765 }
 0x3b6   :  { %v1768_v1 = vpop.eup %1767  ;;  %v850_v40 = vadd.f32 1.0, %v1766_v41 }
 0x3b7   :  { %v851_v8 = vadd.f32 1.0, %v1768_v1 }
 0x3b8   :  { %1771 = vrcp.f32 %v850_v40  ;;  %v864_v45 = vand.u32 2147483648, %v850_v40  ;;  %v862_v41 = vand.u32 2147483647, %v850_v40  ;;  %vm858_vm9 = vweird.f32 %v850_v40 }
 0x3b9   :  { %1773 = vrcp.f32 %v851_v8  ;;  %v1770_v25 = vpop.eup %1769  ;;  %v879_v24 = vand.u32 2147483648, %v851_v8  ;;  %v877_v17 = vand.u32 2147483647, %v851_v8  ;;  %vm873_vm11 = vweird.f32 %v851_v8 }
 0x3ba   :  { %v884_v29 = vmul.f32 %v1770_v25, %v852_v37  ;;  %1775 = vtanh.f32 %v840_v0  ;;  %v865_v3 = vor.u32 1.1754944e-38, %v864_v45  ;;  %vm863_vm12 = vcmp.eq.f32.partialorder %v862_v41, 8.507059e+37  ;;  %v2771_v41 = vld [vmem:[#allocation5 + $0x118] sm:$0xff] }
 0x3bb   :  { %v880_v0 = vor.u32 1.1754944e-38, %v879_v24  ;;  %vm878_vm14 = vcmp.eq.f32.partialorder %v877_v17, 8.507059e+37  ;;  %vm889_vm15 = vweird.f32 %v1770_v25  ;;  %v894_v45 = vand.u32 2147483648, %v852_v37 }
 0x3bc   :  { %v885_v20 = vsub.f32 1.0, %v884_v29  ;;  %vm890_vm1 = vmor %vm888_vm0, %vm889_vm15 }
 0x3be   :  { %v1772_v12 = vpop.eup %1771  ;;  %v886_v10 = vmul.f32 %v1770_v25, %v885_v20  ;;  %v2783_v20 = vld [vmem:[#allocation5 + $0xd8] sm:$0xff] }
 0x3bf   :  { %v1774_v36 = vpop.eup %1773  ;;  %v854_v16 = vmul.f32 %v1772_v12, %v850_v40  ;;  %vm859_vm7 = vweird.f32 %v1772_v12  ;;  %3238 = vst [vmem:[#allocation22_spill] sm:$0xff] %v2783_v20 }
 0x3c0   :  { %v869_v55 = vmul.f32 %v1774_v36, %v851_v8  ;;  %vm874_vm8 = vweird.f32 %v1774_v36  ;;  %vm860_vm10 = vmor %vm858_vm9, %vm859_vm7  ;;  %v887_v40 = vadd.f32 %v1770_v25, %v886_v10  ;;  %v895_v8 = vor.u32 1.1754944e-38, %v894_v45  ;;  %v2735_v10 = vld [vmem:[#allocation5 + $0x1d8] sm:$0xff] }
 0x3c1   :  { %v855_v19 = vsub.f32 1.0, %v854_v16  ;;  %vm875_vm13 = vmor %vm873_vm11, %vm874_vm8  ;;  %v1776_v16 = vpop.eup %1775  ;;  %v2807_v45 = vld [vmem:[#allocation5 + $0x58] sm:$0xff] }
 0x3c2   :  { %v870_v31 = vsub.f32 1.0, %v869_v55  ;;  %v891_v24 = vsel %vm890_vm1, %v1770_v25, %v887_v40  ;;  %v2753_v25 = vld [vmem:[#allocation5 + $0x178] sm:$0xff]  ;;  %v3246_v40 = vld [vmem:[#allocation20_spill] sm:$0xff]  ;;  %3247 = vst [vmem:[#allocation35_spill] sm:$0xff] %v2807_v45 }
 0x3c3   :  { %v856_v61 = vmul.f32 %v1772_v12, %v855_v19  ;;  %v900_v19 = vrot.slane %v2619_v34, 7 }
 0x3c4   :  { %v871_v1 = vmul.f32 %v1774_v36, %v870_v31 }
 0x3c5   :  { %v857_v26 = vadd.f32 %v1772_v12, %v856_v61 }
 0x3c6   :  { %v872_v22 = vadd.f32 %v1774_v36, %v871_v1  ;;  %v2777_v1 = vld [vmem:[#allocation5 + $0xf8] sm:$0xff] }
 0x3c7   :  { %v861_v42 = vsel %vm860_vm10, %v1772_v12, %v857_v26  ;;  %v892_v26 = vand.u32 2147483647, %v852_v37  ;;  %v2747_v37 = vld [vmem:[#allocation5 + $0x198] sm:$0xff] }
 0x3c8   :  { %v876_v55 = vsel %vm875_vm13, %v1774_v36, %v872_v22  ;;  %v866_v11 = vsel %vm863_vm12, %v865_v3, %v861_v42  ;;  %v2759_v22 = vld [vmem:[#allocation5 + $0x158] sm:$0xff] }
 0x3c9   :  { %v881_v31 = vsel %vm878_vm14, %v880_v0, %v876_v55  ;;  %v903_v7 = vmul.f32 %v1776_v16, %v866_v11  ;;  %vm893_vm2 = vcmp.eq.f32.partialorder %v892_v26, 8.507059e+37  ;;  %v2741_v11 = vld [vmem:[#allocation5 + $0x1b8] sm:$0xff]  ;;  %v3248_v26 = vld [vmem:[#allocation32_spill] sm:$0xff] }
 0x3ca   :  { %v902_v29 = vmul.f32 %v900_v19, %v881_v31  ;;  %v896_v17 = vsel %vm893_vm2, %v895_v8, %v891_v24  ;;  %v2765_v36 = vld [vmem:[#allocation5 + $0x138] sm:$0xff]  ;;  %v3242_v19 = vld [vmem:[#allocation19_spill] sm:$0xff]  ;;  %v3250_v8 = vld [vmem:[#allocation28_spill] sm:$0xff] }
 0x3cb   :  { %v2789_v3 = vld [vmem:[#allocation5 + $0xb8] sm:$0xff]  ;;  %v3249_v24 = vld [vmem:[#allocation15_spill] sm:$0xff] }
 0x3cc   :  { %v2723_v61 = vadd.f32 %v903_v7, %v902_v29  ;;  %v2729_v7 = vld [vmem:[#allocation5 + $0x1f8] sm:$0xff]  ;;  %3239 = vst [vmem:[#allocation29_spill] sm:$0xff] %v2789_v3 }
 0x3cd   :  { %v2795_v0 = vld [vmem:[#allocation5 + $0x98] sm:$0xff] }
 0x3ce   :  { %1777 = vtanh.f32 %v2723_v61  ;;  %3240 = vst [vmem:[#allocation33_spill] sm:$0xff] %v2795_v0  ;;  %v3241_v16 = vld [vmem:[#allocation13_spill] sm:$0xff]  ;;  %v3244_v31 = vld [vmem:[#allocation14_spill] sm:$0xff] }
 0x3cf   :  { %v2801_v55 = vld [vmem:[#allocation5 + $0x78] sm:$0xff] }
 0x3d0   :  { %3243 = vst [vmem:[#allocation34_spill] sm:$0xff] %v2801_v55  ;;  %v3245_v29 = vld [vmem:[#allocation25_spill] sm:$0xff] }
 0x3d4   :  { %v1778_v34 = vpop.eup %1777 }
 0x3d5   :  { %v906_v42 = vmul.f32 %v1778_v34, %v896_v17  ;;  %v2813_v34 = vld [vmem:[#allocation5 + $0x38] sm:$0xff]  ;;  %v3252_v17 = vld [vmem:[#allocation16_spill] sm:$0xff] }
 0x3d6   :  { %3251 = vst [vmem:[#allocation36_spill] sm:$0xff] %v2813_v34 }
 0x3d7   :  { %v908_v12 = vrot.slane %v906_v42, 3  ;;  %v3253_v42 = vld [vmem:[#allocation26_spill] sm:$0xff] }
 0x3d9   :  { %926 = vmatmul.f32.vlgmr.msra.gmra.mxu2 %v908_v12  ;;  %946 = vmatmul.f32.vlgmr.msra.gmra.mxu3 %v908_v12 }
 0x3da   :  { %966 = vmatmul.f32.vlgmr.msra.gmra.mxu0 %v908_v12  ;;  %986 = vmatmul.f32.vlgmr.msrb.gmra.mxu1 %v908_v12  ;;  %v3254_v12 = vld [vmem:[#allocation21_spill] sm:$0xff] }
 0x3db   :  { %1240 = vmatpush.msra.mxu2 %v2486_v35  ;;  %1260 = vmatpush.msra.mxu3 %v2489_v60 }
 0x3dc   :  { %1280 = vmatpush.msra.mxu0 %v2624_v21  ;;  %1300 = vmatpush.msrb.mxu1 %v2729_v7 }
 0x3dd   :  { %1241 = vmatpush.msra.mxu2 %v2494_v30  ;;  %1261 = vmatpush.msra.mxu3 %v2497_v18 }
 0x3de   :  { %1281 = vmatpush.msra.mxu0 %v2630_v59  ;;  %1301 = vmatpush.msrb.mxu1 %v2735_v10 }
 0x3df   :  { %1242 = vmatpush.msra.mxu2 %v2502_v32  ;;  %1262 = vmatpush.msra.mxu3 %v2505_v57 }
 0x3e0   :  { %1282 = vmatpush.msra.mxu0 %v2636_v56  ;;  %1302 = vmatpush.msrb.mxu1 %v2741_v11 }
 0x3e1   :  { %1243 = vmatpush.msra.mxu2 %v2510_v44  ;;  %1263 = vmatpush.msra.mxu3 %v2513_v58 }
 0x3e2   :  { %1283 = vmatpush.msra.mxu0 %v2642_v4  ;;  %1303 = vmatpush.msrb.mxu1 %v2747_v37 }
 0x3e3   :  { %1244 = vmatpush.msra.mxu2 %v2518_v47  ;;  %1264 = vmatpush.msra.mxu3 %v2521_v62 }
 0x3e4   :  { %1284 = vmatpush.msra.mxu0 %v2648_v5  ;;  %1304 = vmatpush.msrb.mxu1 %v2753_v25 }
 0x3e5   :  { %1245 = vmatpush.msra.mxu2 %v2526_v48  ;;  %1265 = vmatpush.msra.mxu3 %v2529_v63 }
 0x3e6   :  { %1285 = vmatpush.msra.mxu0 %v2654_v14  ;;  %1305 = vmatpush.msrb.mxu1 %v2759_v22 }
 0x3e7   :  { %1246 = vmatpush.msra.mxu2 %v2534_v49  ;;  %1266 = vmatpush.msra.mxu3 %v2537_v2 }
 0x3e8   :  { %1286 = vmatpush.msra.mxu0 %v2660_v15  ;;  %1306 = vmatpush.msrb.mxu1 %v2765_v36 }
 0x3e9   :  { %1247 = vmatpush.msra.mxu2 %v2542_v50  ;;  %1267 = vmatpush.msra.mxu3 %v2545_v39 }
 0x3ea   :  { %1287 = vmatpush.msra.mxu0 %v2666_v28  ;;  %1307 = vmatpush.msrb.mxu1 %v2771_v41 }
 0x3eb   :  { %1248 = vmatpush.msra.mxu2 %v2550_v51  ;;  %1268 = vmatpush.msra.mxu3 %v2553_v9 }
 0x3ec   :  { %1288 = vmatpush.msra.mxu0 %v2672_v33  ;;  %1308 = vmatpush.msrb.mxu1 %v2777_v1 }
 0x3ed   :  { %1249 = vmatpush.msra.mxu2 %v2558_v52  ;;  %1269 = vmatpush.msra.mxu3 %v2561_v13 }
 0x3ee   :  { %1289 = vmatpush.msra.mxu0 %v2678_v38  ;;  %1309 = vmatpush.msrb.mxu1 %v2783_v20 }
 0x3ef   :  { %1250 = vmatpush.msra.mxu2 %v2566_v53  ;;  %1270 = vmatpush.msra.mxu3 %v2569_v23 }
 0x3f0   :  { %1290 = vmatpush.msra.mxu0 %v2684_v43  ;;  %1310 = vmatpush.msrb.mxu1 %v2789_v3 }
 0x3f1   :  { %1251 = vmatpush.msra.mxu2 %v2574_v54  ;;  %1271 = vmatpush.msra.mxu3 %v2577_v27 }
 0x3f2   :  { %1291 = vmatpush.msra.mxu0 %v2690_v46  ;;  %1311 = vmatpush.msrb.mxu1 %v2795_v0 }
 0x3f3   :  { %1252 = vmatpush.msra.mxu2 %v2582_v6  ;;  %1272 = vmatpush.msra.mxu3 %v3241_v16  ;;  %v3258_v6 = vld [vmem:[#allocation38_spill] sm:$0xff] }
 0x3f4   :  { %1292 = vmatpush.msra.mxu0 %v3242_v19  ;;  %1312 = vmatpush.msrb.mxu1 %v2801_v55 }
 0x3f5   :  { %1253 = vmatpush.msra.mxu2 %v3244_v31  ;;  %1273 = vmatpush.msra.mxu3 %v3245_v29  ;;  %v3256_v29 = vld [vmem:[#allocation39_spill] sm:$0xff] }
 0x3f6   :  { %1293 = vmatpush.msra.mxu0 %v3246_v40  ;;  %1313 = vmatpush.msrb.mxu1 %v2807_v45  ;;  %v2819_v40 = vld [vmem:[#allocation5 + $0x18] sm:$0xff] }
 0x3f7   :  { %1254 = vmatpush.msra.mxu2 %v3248_v26  ;;  %1274 = vmatpush.msra.mxu3 %v3249_v24  ;;  %3255 = vst [vmem:[#allocation41_spill] sm:$0xff] %v2819_v40 }
 0x3f8   :  { %1294 = vmatpush.msra.mxu0 %v3250_v8  ;;  %1314 = vmatpush.msrb.mxu1 %v2813_v34  ;;  %v3257_v34 = vld [vmem:[#allocation37_spill] sm:$0xff] }
 0x3f9   :  { %1255 = vmatpush.msra.mxu2 %v3252_v17  ;;  %1275 = vmatpush.msra.mxu3 %v3253_v42 }
 0x3fa   :  { %1295 = vmatpush.msra.mxu0 %v3254_v12  ;;  %1315 = vmatpush.msrb.mxu1 %v2819_v40 }
 0x457   :  { %v967_v45 = vpop.f32.mrf.mxu0 }
 0x458   :  { %v996_v26 = vrot.slane %v967_v45, 4 }
 0x45a   :  { %v1004_v24 = vadd.f32 %v996_v26, %v3256_v29  ;;  %v987_v26 = vpop.f32.mrf.mxu1 }
 0x45c   :  { %v1697_v31 = vmul.f32 -1.442695, %v1004_v24  ;;  %v927_v8 = vpop.f32.mrf.mxu2  ;;  %v947_v55 = vpop.f32.mrf.mxu3 }
 0x45d   :  { %v994_v19 = vrot.slane %v927_v8, 4  ;;  %v995_v16 = vrot.slane %v947_v55, 4  ;;  %v997_v55 = vrot.slane %v987_v26, 4 }
 0x45e   :  { %1779 = vpow2.f32 %v1697_v31 }
 0x45f   :  { %v1002_v17 = vadd.f32 %v994_v19, %v3257_v34  ;;  %v1003_v42 = vadd.f32 %v995_v16, %v3258_v6  ;;  %v3259_v19 = vld [vmem:[#allocation40_spill] sm:$0xff] }
 0x460   :  { %v1005_v34 = vadd.f32 %v997_v55, %v3259_v19 }
 0x461   :  { %v1695_v0 = vmul.f32 -1.442695, %v1002_v17  ;;  %v1696_v12 = vmul.f32 -1.442695, %v1003_v42 }
 0x463   :  { %1781 = vpow2.f32 %v1695_v0 }
 0x464   :  { %v1780_v46 = vpop.eup %1779  ;;  %1783 = vpow2.f32 %v1696_v12 }
 0x465   :  { %v1017_v40 = vadd.f32 1.0, %v1780_v46 }
 0x467   :  { %1785 = vrcp.f32 %v1017_v40  ;;  %vm1053_vm12 = vweird.f32 %v1017_v40 }
 0x469   :  { %v1782_v27 = vpop.eup %1781 }
 0x46a   :  { %v1784_v45 = vpop.eup %1783  ;;  %v1015_v54 = vadd.f32 1.0, %v1782_v27 }
 0x46b   :  { %v1016_v24 = vadd.f32 1.0, %v1784_v45 }
 0x46c   :  { %1787 = vrcp.f32 %v1015_v54  ;;  %v1029_v46 = vand.u32 2147483648, %v1015_v54  ;;  %v1027_v27 = vand.u32 2147483647, %v1015_v54  ;;  %vm1023_vm5 = vweird.f32 %v1015_v54 }
 0x46d   :  { %1789 = vrcp.f32 %v1016_v24  ;;  %v1786_v31 = vpop.eup %1785  ;;  %v1044_v3 = vand.u32 2147483648, %v1016_v24  ;;  %v1042_v43 = vand.u32 2147483647, %v1016_v24  ;;  %vm1038_vm7 = vweird.f32 %v1016_v24 }
 0x46e   :  { %v1049_v0 = vmul.f32 %v1786_v31, %v1017_v40  ;;  %1791 = vtanh.f32 %v1005_v34  ;;  %v1030_v55 = vor.u32 1.1754944e-38, %v1029_v46  ;;  %vm1028_vm8 = vcmp.eq.f32.partialorder %v1027_v27, 8.507059e+37 }
 0x46f   :  { %v1045_v34 = vor.u32 1.1754944e-38, %v1044_v3  ;;  %vm1043_vm10 = vcmp.eq.f32.partialorder %v1042_v43, 8.507059e+37  ;;  %vm1054_vm11 = vweird.f32 %v1786_v31  ;;  %v1059_v46 = vand.u32 2147483648, %v1017_v40 }
 0x470   :  { %v1050_v26 = vsub.f32 1.0, %v1049_v0  ;;  %vm1055_vm13 = vmor %vm1053_vm12, %vm1054_vm11 }
 0x472   :  { %v1788_v8 = vpop.eup %1787  ;;  %v1051_v38 = vmul.f32 %v1786_v31, %v1050_v26 }
 0x473   :  { %v1790_v16 = vpop.eup %1789  ;;  %v1019_v17 = vmul.f32 %v1788_v8, %v1015_v54  ;;  %vm1024_vm3 = vweird.f32 %v1788_v8 }
 0x474   :  { %v1034_v42 = vmul.f32 %v1790_v16, %v1016_v24  ;;  %vm1039_vm4 = vweird.f32 %v1790_v16  ;;  %vm1025_vm6 = vmor %vm1023_vm5, %vm1024_vm3  ;;  %v1052_v54 = vadd.f32 %v1786_v31, %v1051_v38  ;;  %v1060_v24 = vor.u32 1.1754944e-38, %v1059_v46  ;;  %v3287_v38 = vld [vmem:[#allocation39_spill] sm:$0xff] }
 0x475   :  { %v1020_v6 = vsub.f32 1.0, %v1019_v17  ;;  %vm1040_vm9 = vmor %vm1038_vm7, %vm1039_vm4  ;;  %v1792_v17 = vpop.eup %1791 }
 0x476   :  { %v1035_v12 = vsub.f32 1.0, %v1034_v42  ;;  %v1056_v3 = vsel %vm1055_vm13, %v1786_v31, %v1052_v54 }
 0x477   :  { %v1021_v29 = vmul.f32 %v1788_v8, %v1020_v6  ;;  %v1065_v6 = vrot.slane %v2723_v61, 7 }
 0x478   :  { %v1036_v45 = vmul.f32 %v1790_v16, %v1035_v12 }
 0x479   :  { %v1022_v23 = vadd.f32 %v1788_v8, %v1021_v29 }
 0x47a   :  { %v1037_v19 = vadd.f32 %v1790_v16, %v1036_v45 }
 0x47b   :  { %v1026_v53 = vsel %vm1025_vm6, %v1788_v8, %v1022_v23  ;;  %v1057_v23 = vand.u32 2147483647, %v1017_v40 }
 0x47c   :  { %v1041_v42 = vsel %vm1040_vm9, %v1790_v16, %v1037_v19  ;;  %v1031_v20 = vsel %vm1028_vm8, %v1030_v55, %v1026_v53 }
 0x47d   :  { %v1046_v12 = vsel %vm1043_vm10, %v1045_v34, %v1041_v42  ;;  %v1068_v13 = vmul.f32 %v1792_v17, %v1031_v20  ;;  %vm1058_vm14 = vcmp.eq.f32.partialorder %v1057_v23, 8.507059e+37 }
 0x47e   :  { %v1067_v0 = vmul.f32 %v1065_v6, %v1046_v12  ;;  %v1061_v43 = vsel %vm1058_vm14, %v1060_v24, %v1056_v3  ;;  %v3290_v12 = vld [vmem:[#allocation40_spill] sm:$0xff] }
 0x480   :  { %v2827_v29 = vadd.f32 %v1068_v13, %v1067_v0  ;;  %v3279_v13 = vld [vmem:[#allocation32_spill] sm:$0xff] }
 0x482   :  { %1793 = vtanh.f32 %v2827_v29 }
 0x488   :  { %v1794_v61 = vpop.eup %1793 }
 0x489   :  { %v1071_v53 = vmul.f32 %v1794_v61, %v1061_v43 }
 0x48b   :  { %v1073_v8 = vrot.slane %v1071_v53, 4 }
 0x48d   :  { %1091 = vmatmul.f32.vlgmr.msrb.gmra.mxu2 %v1073_v8  ;;  %1111 = vmatmul.f32.vlgmr.msrb.gmra.mxu3 %v1073_v8 }
 0x48e   :  { %1131 = vmatmul.f32.vlgmr.msrb.gmra.mxu0 %v1073_v8  ;;  %1151 = vmatmul.f32.vlgmr.msra.gmra.mxu1 %v1073_v8 }
 0x48f   :  { %1405 = vmatpush.msrb.mxu2 %v2486_v35  ;;  %1425 = vmatpush.msrb.mxu3 %v2489_v60  ;;  %v3260_v35 = vld [vmem:[#allocation23_spill] sm:$0xff]  ;;  %v3261_v60 = vld [vmem:[#allocation17_spill] sm:$0xff] }
 0x490   :  { %1445 = vmatpush.msrb.mxu0 %v2624_v21  ;;  %1465 = vmatpush.msra.mxu1 %v2729_v7  ;;  %v3280_v21 = vld [vmem:[#allocation15_spill] sm:$0xff] }
 0x491   :  { %1406 = vmatpush.msrb.mxu2 %v2494_v30  ;;  %1426 = vmatpush.msrb.mxu3 %v2497_v18  ;;  %v3262_v30 = vld [vmem:[#allocation22_spill] sm:$0xff] }
 0x492   :  { %1446 = vmatpush.msrb.mxu0 %v2630_v59  ;;  %1466 = vmatpush.msra.mxu1 %v2735_v10  ;;  %v3263_v18 = vld [vmem:[#allocation30_spill] sm:$0xff]  ;;  %v3281_v59 = vld [vmem:[#allocation28_spill] sm:$0xff] }
 0x493   :  { %1407 = vmatpush.msrb.mxu2 %v2502_v32  ;;  %1427 = vmatpush.msrb.mxu3 %v2505_v57  ;;  %v3264_v32 = vld [vmem:[#allocation11_spill] sm:$0xff]  ;;  %v3265_v57 = vld [vmem:[#allocation18_spill] sm:$0xff] }
 0x494   :  { %1447 = vmatpush.msrb.mxu0 %v2636_v56  ;;  %1467 = vmatpush.msra.mxu1 %v2741_v11  ;;  %v3282_v56 = vld [vmem:[#allocation36_spill] sm:$0xff] }
 0x495   :  { %1408 = vmatpush.msrb.mxu2 %v2510_v44  ;;  %1428 = vmatpush.msrb.mxu3 %v2513_v58  ;;  %v3266_v44 = vld [vmem:[#allocation29_spill] sm:$0xff]  ;;  %v3267_v58 = vld [vmem:[#allocation12_spill] sm:$0xff] }
 0x496   :  { %1448 = vmatpush.msrb.mxu0 %v2642_v4  ;;  %1468 = vmatpush.msra.mxu1 %v2747_v37  ;;  %v3283_v4 = vld [vmem:[#allocation16_spill] sm:$0xff] }
 0x497   :  { %1409 = vmatpush.msrb.mxu2 %v2518_v47  ;;  %1429 = vmatpush.msrb.mxu3 %v2521_v62  ;;  %v3268_v47 = vld [vmem:[#allocation24_spill] sm:$0xff]  ;;  %v3269_v62 = vld [vmem:[#allocation27_spill] sm:$0xff] }
 0x498   :  { %1449 = vmatpush.msrb.mxu0 %v2648_v5  ;;  %1469 = vmatpush.msra.mxu1 %v2753_v25  ;;  %v3284_v5 = vld [vmem:[#allocation26_spill] sm:$0xff] }
 0x499   :  { %1410 = vmatpush.msrb.mxu2 %v2526_v48  ;;  %1430 = vmatpush.msrb.mxu3 %v2529_v63  ;;  %v3270_v48 = vld [vmem:[#allocation33_spill] sm:$0xff]  ;;  %v3271_v63 = vld [vmem:[#allocation31_spill] sm:$0xff] }
 0x49a   :  { %1450 = vmatpush.msrb.mxu0 %v2654_v14  ;;  %1470 = vmatpush.msra.mxu1 %v2759_v22  ;;  %v3285_v14 = vld [vmem:[#allocation21_spill] sm:$0xff] }
 0x49b   :  { %1411 = vmatpush.msrb.mxu2 %v2534_v49  ;;  %1431 = vmatpush.msrb.mxu3 %v2537_v2  ;;  %v3272_v49 = vld [vmem:[#allocation13_spill] sm:$0xff]  ;;  %v3273_v2 = vld [vmem:[#allocation19_spill] sm:$0xff] }
 0x49c   :  { %1451 = vmatpush.msrb.mxu0 %v2660_v15  ;;  %1471 = vmatpush.msra.mxu1 %v2765_v36  ;;  %v3286_v15 = vld [vmem:[#allocation41_spill] sm:$0xff] }
 0x49d   :  { %1412 = vmatpush.msrb.mxu2 %v2542_v50  ;;  %1432 = vmatpush.msrb.mxu3 %v2545_v39  ;;  %v3274_v50 = vld [vmem:[#allocation34_spill] sm:$0xff]  ;;  %v3288_v36 = vld [vmem:[#allocation37_spill] sm:$0xff] }
 0x49e   :  { %1452 = vmatpush.msrb.mxu0 %v2666_v28  ;;  %1472 = vmatpush.msra.mxu1 %v2771_v41  ;;  %v3275_v39 = vld [vmem:[#allocation14_spill] sm:$0xff] }
 0x49f   :  { %1413 = vmatpush.msrb.mxu2 %v2550_v51  ;;  %1433 = vmatpush.msrb.mxu3 %v2553_v9  ;;  %v3276_v51 = vld [vmem:[#allocation25_spill] sm:$0xff]  ;;  %v3277_v9 = vld [vmem:[#allocation20_spill] sm:$0xff] }
 0x4a0   :  { %1453 = vmatpush.msrb.mxu0 %v2672_v33  ;;  %1473 = vmatpush.msra.mxu1 %v2777_v1  ;;  %v3289_v1 = vld [vmem:[#allocation38_spill] sm:$0xff] }
 0x4a1   :  { %1414 = vmatpush.msrb.mxu2 %v2558_v52  ;;  %1434 = vmatpush.msrb.mxu3 %v3260_v35  ;;  %v3278_v52 = vld [vmem:[#allocation35_spill] sm:$0xff] }
 0x4a2   :  { %1454 = vmatpush.msrb.mxu0 %v3261_v60  ;;  %1474 = vmatpush.msra.mxu1 %v3262_v30 }
 0x4a3   :  { %1415 = vmatpush.msrb.mxu2 %v3263_v18  ;;  %1435 = vmatpush.msrb.mxu3 %v3264_v32 }
 0x4a4   :  { %1455 = vmatpush.msrb.mxu0 %v3265_v57  ;;  %1475 = vmatpush.msra.mxu1 %v3266_v44 }
 0x4a5   :  { %1416 = vmatpush.msrb.mxu2 %v3267_v58  ;;  %1436 = vmatpush.msrb.mxu3 %v3268_v47 }
 0x4a6   :  { %1456 = vmatpush.msrb.mxu0 %v3269_v62  ;;  %1476 = vmatpush.msra.mxu1 %v3270_v48  ;;  %v1230_v48 = vrot.slane %v2827_v29, 7 }
 0x4a7   :  { %1417 = vmatpush.msrb.mxu2 %v3271_v63  ;;  %1437 = vmatpush.msrb.mxu3 %v3272_v49 }
 0x4a8   :  { %1457 = vmatpush.msrb.mxu0 %v3273_v2  ;;  %1477 = vmatpush.msra.mxu1 %v3274_v50 }
 0x4a9   :  { %1418 = vmatpush.msrb.mxu2 %v3275_v39  ;;  %1438 = vmatpush.msrb.mxu3 %v3276_v51 }
 0x4aa   :  { %1458 = vmatpush.msrb.mxu0 %v3277_v9  ;;  %1478 = vmatpush.msra.mxu1 %v3278_v52 }
 0x4ab   :  { %1419 = vmatpush.msrb.mxu2 %v3279_v13  ;;  %1439 = vmatpush.msrb.mxu3 %v3280_v21 }
 0x4ac   :  { %1459 = vmatpush.msrb.mxu0 %v3281_v59  ;;  %1479 = vmatpush.msra.mxu1 %v3282_v56 }
 0x4ad   :  { %1420 = vmatpush.msrb.mxu2 %v3283_v4  ;;  %1440 = vmatpush.msrb.mxu3 %v3284_v5 }
 0x4ae   :  { %1460 = vmatpush.msrb.mxu0 %v3285_v14  ;;  %1480 = vmatpush.msra.mxu1 %v3286_v15 }
 0x50b   :  { %v1132_v28 = vpop.f32.mrf.mxu0  ;;  %v1152_v55 = vpop.f32.mrf.mxu1 }
 0x50c   :  { %v1161_v33 = vrot.slane %v1132_v28, 3  ;;  %v1162_v17 = vrot.slane %v1152_v55, 3 }
 0x50e   :  { %v1169_v7 = vadd.f32 %v1161_v33, %v3287_v38  ;;  %v1170_v0 = vadd.f32 %v1162_v17, %v3290_v12 }
 0x510   :  { %v1700_v10 = vmul.f32 -1.442695, %v1169_v7  ;;  %v1092_v11 = vpop.f32.mrf.mxu2  ;;  %v1112_v37 = vpop.f32.mrf.mxu3 }
 0x511   :  { %v1159_v25 = vrot.slane %v1092_v11, 3  ;;  %v1160_v22 = vrot.slane %v1112_v37, 3 }
 0x512   :  { %1795 = vpow2.f32 %v1700_v10 }
 0x513   :  { %v1167_v41 = vadd.f32 %v1159_v25, %v3288_v36  ;;  %v1168_v20 = vadd.f32 %v1160_v22, %v3289_v1 }
 0x515   :  { %v1698_v40 = vmul.f32 -1.442695, %v1167_v41  ;;  %v1699_v31 = vmul.f32 -1.442695, %v1168_v20 }
 0x517   :  { %1797 = vpow2.f32 %v1698_v40 }
 0x518   :  { %v1796_v19 = vpop.eup %1795  ;;  %1799 = vpow2.f32 %v1699_v31 }
 0x519   :  { %v1182_v16 = vadd.f32 1.0, %v1796_v19 }
 0x51b   :  { %1801 = vrcp.f32 %v1182_v16  ;;  %v1224_v13 = vand.u32 2147483648, %v1182_v16  ;;  %vm1218_vm8 = vweird.f32 %v1182_v16  ;;  %v1222_v21 = vand.u32 2147483647, %v1182_v16 }
 0x51d   :  { %v1798_v27 = vpop.eup %1797  ;;  %v1225_v56 = vor.u32 1.1754944e-38, %v1224_v13  ;;  %vm1223_vm10 = vcmp.eq.f32.partialorder %v1222_v21, 8.507059e+37 }
 0x51e   :  { %v1800_v45 = vpop.eup %1799  ;;  %v1180_v26 = vadd.f32 1.0, %v1798_v27 }
 0x51f   :  { %v1181_v34 = vadd.f32 1.0, %v1800_v45 }
 0x520   :  { %1803 = vrcp.f32 %v1180_v26  ;;  %v1194_v61 = vand.u32 2147483648, %v1180_v26  ;;  %v1192_v8 = vand.u32 2147483647, %v1180_v26  ;;  %vm1188_vm1 = vweird.f32 %v1180_v26 }
 0x521   :  { %1805 = vrcp.f32 %v1181_v34  ;;  %v1802_v6 = vpop.eup %1801  ;;  %v1209_v35 = vand.u32 2147483648, %v1181_v34  ;;  %v1207_v30 = vand.u32 2147483647, %v1181_v34  ;;  %vm1203_vm3 = vweird.f32 %v1181_v34 }
 0x522   :  { %v1214_v3 = vmul.f32 %v1802_v6, %v1182_v16  ;;  %1807 = vtanh.f32 %v1170_v0  ;;  %v1195_v57 = vor.u32 1.1754944e-38, %v1194_v61  ;;  %vm1193_vm4 = vcmp.eq.f32.partialorder %v1192_v8, 8.507059e+37 }
 0x523   :  { %v1210_v47 = vor.u32 1.1754944e-38, %v1209_v35  ;;  %vm1208_vm6 = vcmp.eq.f32.partialorder %v1207_v30, 8.507059e+37  ;;  %vm1219_vm7 = vweird.f32 %v1802_v6 }
 0x524   :  { %v1215_v18 = vsub.f32 1.0, %v1214_v3  ;;  %vm1220_vm9 = vmor %vm1218_vm8, %vm1219_vm7 }
 0x526   :  { %v1804_v42 = vpop.eup %1803  ;;  %v1216_v50 = vmul.f32 %v1802_v6, %v1215_v18 }
 0x527   :  { %v1806_v54 = vpop.eup %1805  ;;  %v1184_v46 = vmul.f32 %v1804_v42, %v1180_v26  ;;  %vm1189_vm15 = vweird.f32 %v1804_v42 }
 0x528   :  { %v1199_v23 = vmul.f32 %v1806_v54, %v1181_v34  ;;  %vm1204_vm0 = vweird.f32 %v1806_v54  ;;  %vm1190_vm2 = vmor %vm1188_vm1, %vm1189_vm15  ;;  %v1808_v62 = vpop.eup %1807  ;;  %v1217_v52 = vadd.f32 %v1802_v6, %v1216_v50 }
 0x529   :  { %v1185_v24 = vsub.f32 1.0, %v1184_v46  ;;  %vm1205_vm5 = vmor %vm1203_vm3, %vm1204_vm0 }
 0x52a   :  { %v1200_v43 = vsub.f32 1.0, %v1199_v23  ;;  %v1221_v59 = vsel %vm1220_vm9, %v1802_v6, %v1217_v52 }
 0x52b   :  { %v1186_v53 = vmul.f32 %v1804_v42, %v1185_v24  ;;  %v1226_v4 = vsel %vm1223_vm10, %v1225_v56, %v1221_v59 }
 0x52c   :  { %v1201_v60 = vmul.f32 %v1806_v54, %v1200_v43 }
 0x52d   :  { %v1187_v32 = vadd.f32 %v1804_v42, %v1186_v53 }
 0x52e   :  { %v1202_v44 = vadd.f32 %v1806_v54, %v1201_v60 }
 0x52f   :  { %v1191_v58 = vsel %vm1190_vm2, %v1804_v42, %v1187_v32 }
 0x530   :  { %v1206_v63 = vsel %vm1205_vm5, %v1806_v54, %v1202_v44  ;;  %v1196_v49 = vsel %vm1193_vm4, %v1195_v57, %v1191_v58 }
 0x531   :  { %v1211_v2 = vsel %vm1208_vm6, %v1210_v47, %v1206_v63  ;;  %v1233_v39 = vmul.f32 %v1808_v62, %v1196_v49 }
 0x532   :  { %v1232_v51 = vmul.f32 %v1230_v48, %v1211_v2 }
 0x534   :  { %v2899_v9 = vadd.f32 %v1233_v39, %v1232_v51 }
 0x536   :  { %1809 = vtanh.f32 %v2899_v9  ;;  %v1395_v62 = vrot.slane %v2899_v9, 7 }
 0x53c   :  { %v1810_v29 = vpop.eup %1809 }
 0x53d   :  { %v1236_v5 = vmul.f32 %v1810_v29, %v1226_v4 }
 0x53f   :  { %v1238_v14 = vrot.slane %v1236_v5, 5 }
 0x541   :  { %1256 = vmatmul.f32.vlgmr.msra.gmra.mxu2 %v1238_v14  ;;  %1276 = vmatmul.f32.vlgmr.msra.gmra.mxu3 %v1238_v14 }
 0x542   :  { %1296 = vmatmul.f32.vlgmr.msra.gmra.mxu0 %v1238_v14  ;;  %1316 = vmatmul.f32.vlgmr.msrb.gmra.mxu1 %v1238_v14  ;;  %v1582_v14 = vld [vmem:[%s3042_s5 + $0x78] sm:$0xff] }
 0x543   :  { %1587 = vmatpush.msra.mxu2 %v1582_v14 }
 0x5bf   :  { %v1297_v15 = vpop.f32.mrf.mxu0  ;;  %v1317_v26 = vpop.f32.mrf.mxu1 }
 0x5c0   :  { %v1326_v28 = vrot.slane %v1297_v15, 2  ;;  %v1327_v34 = vrot.slane %v1317_v26, 2  ;;  %v1581_v15 = vld [vmem:[%s3042_s5 + $0x70] sm:$0xff] }
 0x5c1   :  { %1588 = vmatpush.msra.mxu2 %v1581_v15 }
 0x5c2   :  { %v1334_v33 = vadd.f32 %v1326_v28, %v3287_v38  ;;  %v1335_v42 = vadd.f32 %v1327_v34, %v3290_v12  ;;  %v1580_v28 = vld [vmem:[%s3042_s5 + $0x68] sm:$0xff] }
 0x5c3   :  { %1589 = vmatpush.msra.mxu2 %v1580_v28  ;;  %v1615_v28 = vld [vmem:[%s3044_s7 + $0x38] sm:$0xff] }
 0x5c4   :  { %v1703_v7 = vmul.f32 -1.442695, %v1334_v33  ;;  %v1257_v10 = vpop.f32.mrf.mxu2  ;;  %v1277_v11 = vpop.f32.mrf.mxu3  ;;  %v1579_v33 = vld [vmem:[%s3042_s5 + $0x60] sm:$0xff] }
 0x5c5   :  { %v1324_v37 = vrot.slane %v1257_v10, 2  ;;  %v1325_v25 = vrot.slane %v1277_v11, 2  ;;  %1590 = vmatpush.msra.mxu2 %v1579_v33  ;;  %v1577_v11 = vld [vmem:[%s3042_s5 + $0x50] sm:$0xff] }
 0x5c6   :  { %1811 = vpow2.f32 %v1703_v7  ;;  %v1578_v7 = vld [vmem:[%s3042_s5 + $0x58] sm:$0xff] }
 0x5c7   :  { %v1332_v22 = vadd.f32 %v1324_v37, %v3288_v36  ;;  %v1333_v41 = vadd.f32 %v1325_v25, %v3289_v1  ;;  %1591 = vmatpush.msra.mxu2 %v1578_v7  ;;  %v1576_v25 = vld [vmem:[%s3042_s5 + $0x48] sm:$0xff] }
 0x5c9   :  { %v1701_v20 = vmul.f32 -1.442695, %v1332_v22  ;;  %v1702_v40 = vmul.f32 -1.442695, %v1333_v41  ;;  %1592 = vmatpush.msra.mxu2 %v1577_v11  ;;  %v1575_v41 = vld [vmem:[%s3042_s5 + $0x40] sm:$0xff] }
 0x5cb   :  { %1813 = vpow2.f32 %v1701_v20  ;;  %1593 = vmatpush.msra.mxu2 %v1576_v25  ;;  %v1574_v20 = vld [vmem:[%s3042_s5 + $0x38] sm:$0xff] }
 0x5cc   :  { %v1812_v31 = vpop.eup %1811  ;;  %1815 = vpow2.f32 %v1702_v40 }
 0x5cd   :  { %v1347_v19 = vadd.f32 1.0, %v1812_v31  ;;  %1594 = vmatpush.msra.mxu2 %v1575_v41  ;;  %v1614_v41 = vld [vmem:[%s3044_s7 + $0x30] sm:$0xff] }
 0x5cf   :  { %1817 = vrcp.f32 %v1347_v19  ;;  %v1389_v13 = vand.u32 2147483648, %v1347_v19  ;;  %vm1383_vm4 = vweird.f32 %v1347_v19  ;;  %v1387_v21 = vand.u32 2147483647, %v1347_v19  ;;  %1595 = vmatpush.msra.mxu2 %v1574_v20 }
 0x5d1   :  { %v1814_v16 = vpop.eup %1813  ;;  %v1390_v56 = vor.u32 1.1754944e-38, %v1389_v13  ;;  %vm1388_vm6 = vcmp.eq.f32.partialorder %v1387_v21, 8.507059e+37  ;;  %v1617_v13 = vld [vmem:[%s3044_s7 + $0x48] sm:$0xff] }
 0x5d2   :  { %v1816_v27 = vpop.eup %1815  ;;  %v1345_v45 = vadd.f32 1.0, %v1814_v16 }
 0x5d3   :  { %v1346_v55 = vadd.f32 1.0, %v1816_v27 }
 0x5d4   :  { %1819 = vrcp.f32 %v1345_v45  ;;  %v1359_v24 = vand.u32 2147483648, %v1345_v45  ;;  %v1357_v53 = vand.u32 2147483647, %v1345_v45  ;;  %vm1353_vm13 = vweird.f32 %v1345_v45 }
 0x5d5   :  { %1821 = vrcp.f32 %v1346_v55  ;;  %v1818_v17 = vpop.eup %1817  ;;  %v1374_v8 = vand.u32 2147483648, %v1346_v55  ;;  %v1372_v60 = vand.u32 2147483647, %v1346_v55  ;;  %vm1368_vm15 = vweird.f32 %v1346_v55 }
 0x5d6   :  { %v1379_v23 = vmul.f32 %v1818_v17, %v1347_v19  ;;  %1823 = vtanh.f32 %v1335_v42  ;;  %v1360_v32 = vor.u32 1.1754944e-38, %v1359_v24  ;;  %vm1358_vm0 = vcmp.eq.f32.partialorder %v1357_v53, 8.507059e+37  ;;  %v1570_v42 = vld [vmem:[%s3042_s5 + $0x18] sm:$0xff] }
 0x5d7   :  { %v1375_v58 = vor.u32 1.1754944e-38, %v1374_v8  ;;  %vm1373_vm2 = vcmp.eq.f32.partialorder %v1372_v60, 8.507059e+37  ;;  %vm1384_vm3 = vweird.f32 %v1818_v17  ;;  %v1623_v53 = vld [vmem:[%s3044_s7 + $0x78] sm:$0xff]  ;;  %v1622_v8 = vld [vmem:[%s3044_s7 + $0x70] sm:$0xff]  ;;  %v1621_v60 = vld [vmem:[%s3044_s7 + $0x68] sm:$0xff] }
 0x5d8   :  { %v1380_v30 = vsub.f32 1.0, %v1379_v23  ;;  %vm1385_vm5 = vmor %vm1383_vm4, %vm1384_vm3  ;;  %v1567_v23 = vld [vmem:[%s3042_s5] sm:$0xff]  ;;  %1625 = vmatpush.msra.mxu3 %v1623_v53  ;;  %vm1645_vm3 = vcmask 253952  }
 0x5da   :  { %v1820_v6 = vpop.eup %1819  ;;  %v1381_v2 = vmul.f32 %v1818_v17, %v1380_v30  ;;  %1626 = vmatpush.msra.mxu3 %v1622_v8 }
 0x5db   :  { %v1822_v0 = vpop.eup %1821  ;;  %v1349_v54 = vmul.f32 %v1820_v6, %v1345_v45  ;;  %vm1354_vm11 = vweird.f32 %v1820_v6  ;;  %v1573_v45 = vld [vmem:[%s3042_s5 + $0x30] sm:$0xff] }
 0x5dc   :  { %v1364_v46 = vmul.f32 %v1822_v0, %v1346_v55  ;;  %vm1369_vm12 = vweird.f32 %v1822_v0  ;;  %vm1355_vm14 = vmor %vm1353_vm13, %vm1354_vm11  ;;  %v1824_v47 = vpop.eup %1823  ;;  %v1382_v52 = vadd.f32 %v1818_v17, %v1381_v2  ;;  %v1572_v55 = vld [vmem:[%s3042_s5 + $0x28] sm:$0xff]  ;;  %1596 = vmatpush.msra.mxu2 %v1573_v45  ;;  %1627 = vmatpush.msra.mxu3 %v1621_v60  ;;  %v1611_v45 = vld [vmem:[%s3044_s7 + $0x18] sm:$0xff] }
 0x5dd   :  { %v1350_v3 = vsub.f32 1.0, %v1349_v54  ;;  %vm1370_vm1 = vmor %vm1368_vm15, %vm1369_vm12  ;;  %v1568_v54 = vld [vmem:[%s3042_s5 + $0x8] sm:$0xff] }
 0x5de   :  { %v1365_v61 = vsub.f32 1.0, %v1364_v46  ;;  %v1386_v59 = vsel %vm1385_vm5, %v1818_v17, %v1382_v52  ;;  %1597 = vmatpush.msra.mxu2 %v1572_v55 }
 0x5df   :  { %v1351_v43 = vmul.f32 %v1820_v6, %v1350_v3  ;;  %v1391_v29 = vsel %vm1388_vm6, %v1390_v56, %v1386_v59 }
 0x5e0   :  { %v1366_v35 = vmul.f32 %v1822_v0, %v1365_v61 }
 0x5e1   :  { %v1352_v18 = vadd.f32 %v1820_v6, %v1351_v43 }
 0x5e2   :  { %v1367_v57 = vadd.f32 %v1822_v0, %v1366_v35 }
 0x5e3   :  { %v1356_v44 = vsel %vm1355_vm14, %v1820_v6, %v1352_v18  ;;  %v1571_v6 = vld [vmem:[%s3042_s5 + $0x20] sm:$0xff] }
 0x5e4   :  { %v1371_v48 = vsel %vm1370_vm1, %v1822_v0, %v1367_v57  ;;  %v1361_v63 = vsel %vm1358_vm0, %v1360_v32, %v1356_v44  ;;  %1598 = vmatpush.msra.mxu2 %v1571_v6  ;;  %v1620_v18 = vld [vmem:[%s3044_s7 + $0x60] sm:$0xff] }
 0x5e5   :  { %v1376_v49 = vsel %vm1373_vm2, %v1375_v58, %v1371_v48  ;;  %v1398_v50 = vmul.f32 %v1824_v47, %v1361_v63  ;;  %v1619_v47 = vld [vmem:[%s3044_s7 + $0x58] sm:$0xff]  ;;  %1628 = vmatpush.msra.mxu3 %v1620_v18 }
 0x5e6   :  { %v1397_v39 = vmul.f32 %v1395_v62, %v1376_v49  ;;  %1599 = vmatpush.msra.mxu2 %v1570_v42  ;;  %v1618_v49 = vld [vmem:[%s3044_s7 + $0x50] sm:$0xff] }
 0x5e7   :  { %1629 = vmatpush.msra.mxu3 %v1619_v47  ;;  %v1610_v42 = vld [vmem:[%s3044_s7 + $0x10] sm:$0xff] }
 0x5e8   :  { %v2907_v51 = vadd.f32 %v1398_v50, %v1397_v39 }
 0x5e9   :  { %1630 = vmatpush.msra.mxu3 %v1618_v49 }
 0x5ea   :  { %1825 = vtanh.f32 %v2907_v51  ;;  %v1560_v7 = vrot.slane %v2907_v51, 7 }
 0x5eb   :  { %1631 = vmatpush.msra.mxu3 %v1617_v13 }
 0x5f0   :  { %v1826_v9 = vpop.eup %1825 }
 0x5f1   :  { %v1401_v4 = vmul.f32 %v1826_v9, %v1391_v29  ;;  %v1616_v29 = vld [vmem:[%s3044_s7 + $0x40] sm:$0xff] }
 0x5f2   :  { %1632 = vmatpush.msra.mxu3 %v1616_v29 }
 0x5f3   :  { %v1403_v5 = vrot.slane %v1401_v4, 6 }
 0x5f4   :  { %1633 = vmatpush.msra.mxu3 %v1615_v28 }
 0x5f5   :  { %1421 = vmatmul.f32.vlgmr.msrb.gmra.mxu2 %v1403_v5  ;;  %1441 = vmatmul.f32.vlgmr.msrb.gmra.mxu3 %v1403_v5 }
 0x5f6   :  { %1461 = vmatmul.f32.vlgmr.msrb.gmra.mxu0 %v1403_v5  ;;  %1481 = vmatmul.f32.vlgmr.msra.gmra.mxu1 %v1403_v5 }
 0x5f7   :  { %1634 = vmatpush.msra.mxu3 %v1614_v41 }
 0x673   :  { %v1462_v10 = vpop.f32.mrf.mxu0  ;;  %v1482_v61 = vpop.f32.mrf.mxu1 }
 0x674   :  { %v1491_v37 = vrot.slane %v1462_v10, 1  ;;  %v1492_v35 = vrot.slane %v1482_v61, 1 }
 0x676   :  { %v1499_v22 = vadd.f32 %v1491_v37, %v3287_v38  ;;  %v1500_v57 = vadd.f32 %v1492_v35, %v3290_v12 }
 0x678   :  { %v1706_v40 = vmul.f32 -1.442695, %v1499_v22  ;;  %v1422_v31 = vpop.f32.mrf.mxu2  ;;  %v1442_v19 = vpop.f32.mrf.mxu3 }
 0x679   :  { %v1489_v16 = vrot.slane %v1422_v31, 1  ;;  %v1490_v27 = vrot.slane %v1442_v19, 1  ;;  %v1612_v19 = vld [vmem:[%s3044_s7 + $0x20] sm:$0xff] }
 0x67a   :  { %1827 = vpow2.f32 %v1706_v40  ;;  %v1613_v40 = vld [vmem:[%s3044_s7 + $0x28] sm:$0xff] }
 0x67b   :  { %v1497_v38 = vadd.f32 %v1489_v16, %v3288_v36  ;;  %v1498_v26 = vadd.f32 %v1490_v27, %v3289_v1  ;;  %v1569_v1 = vld [vmem:[%s3042_s5 + $0x10] sm:$0xff]  ;;  %1635 = vmatpush.msra.mxu3 %v1613_v40 }
 0x67c   :  { %1600 = vmatpush.msra.mxu2 %v1569_v1  ;;  %v1608_v1 = vld [vmem:[%s3044_s7] sm:$0xff] }
 0x67d   :  { %v1704_v34 = vmul.f32 -1.442695, %v1497_v38  ;;  %v1705_v17 = vmul.f32 -1.442695, %v1498_v26  ;;  %1636 = vmatpush.msra.mxu3 %v1612_v19 }
 0x67e   :  { %1601 = vmatpush.msra.mxu2 %v1568_v54 }
 0x67f   :  { %1829 = vpow2.f32 %v1704_v34  ;;  %1637 = vmatpush.msra.mxu3 %v1611_v45 }
 0x680   :  { %v1828_v36 = vpop.eup %1827  ;;  %1831 = vpow2.f32 %v1705_v17  ;;  %1602 = vmatpush.msra.mxu2 %v1567_v23 }
 0x681   :  { %v2955_v0 = vadd.f32 1.0, %v1828_v36  ;;  %1638 = vmatpush.msra.mxu3 %v1610_v42  ;;  %v1609_v36 = vld [vmem:[%s3044_s7 + $0x8] sm:$0xff] }
 0x683   :  { %1833 = vrcp.f32 %v2955_v0  ;;  %v1554_v16 = vand.u32 2147483648, %v2955_v0  ;;  %vm1548_vm0 = vweird.f32 %v2955_v0  ;;  %v1552_v27 = vand.u32 2147483647, %v2955_v0  ;;  %1639 = vmatpush.msra.mxu3 %v1609_v36 }
 0x685   :  { %v1830_v46 = vpop.eup %1829  ;;  %v1555_v26 = vor.u32 1.1754944e-38, %v1554_v16  ;;  %vm1553_vm2 = vcmp.eq.f32.partialorder %v1552_v27, 8.507059e+37  ;;  %1640 = vmatpush.msra.mxu3 %v1608_v1 }
 0x686   :  { %v1832_v3 = vpop.eup %1831  ;;  %v1510_v24 = vadd.f32 1.0, %v1830_v46 }
 0x687   :  { %v1511_v43 = vadd.f32 1.0, %v1832_v3  ;;  %v1624_v3 = vld [vmem:[%s3045_s8] sm:$0x1] }
 0x688   :  { %1835 = vrcp.f32 %v1510_v24  ;;  %v1524_v2 = vand.u32 2147483648, %v1510_v24  ;;  %v1522_v39 = vand.u32 2147483647, %v1510_v24  ;;  %vm1518_vm9 = vweird.f32 %v1510_v24 }
 0x689   :  { %1837 = vrcp.f32 %v1511_v43  ;;  %v2973_v30 = vpop.eup %1833  ;;  %v1539_v52 = vand.u32 2147483648, %v1511_v43  ;;  %v1537_v59 = vand.u32 2147483647, %v1511_v43  ;;  %vm1533_vm11 = vweird.f32 %v1511_v43 }
 0x68a   :  { %v1544_v48 = vmul.f32 %v2973_v30, %v2955_v0  ;;  %1839 = vtanh.f32 %v1500_v57  ;;  %v1525_v4 = vor.u32 1.1754944e-38, %v1524_v2  ;;  %vm1523_vm12 = vcmp.eq.f32.partialorder %v1522_v39, 8.507059e+37  ;;  %v1583_v0 = vld [vmem:[%s3043_s6] sm:$0x1]  ;;  %s1995_s6 = smov [#allocation7]  }
 0x68b   :  { %v1540_v14 = vor.u32 1.1754944e-38, %v1539_v52  ;;  %vm1538_vm14 = vcmp.eq.f32.partialorder %v1537_v59, 8.507059e+37  ;;  %vm1549_vm15 = vweird.f32 %v2973_v30  ;;  %s1664_s7 = sshll.u32 %s1995_s6, 4  ;;  %s1665_s7 = int_to_ptr.vmem [resolvable:$true] %s1664_s7 }
 0x68c   :  { %v1545_v56 = vsub.f32 1.0, %v1544_v48  ;;  %vm1550_vm1 = vmor %vm1548_vm0, %vm1549_vm15 }
 0x68e   :  { %v1836_v32 = vpop.eup %1835  ;;  %v1546_v25 = vmul.f32 %v2973_v30, %v1545_v56 }
 0x68f   :  { %v1838_v44 = vpop.eup %1837  ;;  %v1514_v58 = vmul.f32 %v1836_v32, %v1510_v24  ;;  %vm1519_vm7 = vweird.f32 %v1836_v32 }
 0x690   :  { %v1529_v62 = vmul.f32 %v1838_v44, %v1511_v43  ;;  %vm1534_vm8 = vweird.f32 %v1838_v44  ;;  %vm1520_vm10 = vmor %vm1518_vm9, %vm1519_vm7  ;;  %v1840_v33 = vpop.eup %1839  ;;  %v1547_v51 = vadd.f32 %v2973_v30, %v1546_v25 }
 0x691   :  { %v1515_v63 = vsub.f32 1.0, %v1514_v58  ;;  %vm1535_vm13 = vmor %vm1533_vm11, %vm1534_vm8 }
 0x692   :  { %v1530_v12 = vsub.f32 1.0, %v1529_v62  ;;  %v1551_v38 = vsel %vm1550_vm1, %v2973_v30, %v1547_v51 }
 0x693   :  { %v1516_v50 = vmul.f32 %v1836_v32, %v1515_v63  ;;  %v1556_v34 = vsel %vm1553_vm2, %v1555_v26, %v1551_v38 }
 0x694   :  { %v1531_v21 = vmul.f32 %v1838_v44, %v1530_v12 }
 0x695   :  { %v1517_v9 = vadd.f32 %v1836_v32, %v1516_v50 }
 0x696   :  { %v1532_v5 = vadd.f32 %v1838_v44, %v1531_v21 }
 0x697   :  { %v1521_v15 = vsel %vm1520_vm10, %v1836_v32, %v1517_v9 }
 0x698   :  { %v1526_v10 = vsel %vm1523_vm12, %v1525_v4, %v1521_v15  ;;  %v1536_v11 = vsel %vm1535_vm13, %v1838_v44, %v1532_v5 }
 0x699   :  { %v1541_v37 = vsel %vm1538_vm14, %v1540_v14, %v1536_v11  ;;  %v1563_v22 = vmul.f32 %v1840_v33, %v1526_v10 }
 0x69a   :  { %v1562_v20 = vmul.f32 %v1560_v7, %v1541_v37 }
 0x69c   :  { %v1564_v31 = vadd.f32 %v1563_v22, %v1562_v20 }
 0x69e   :  { %1841 = vtanh.f32 %v1564_v31 }
 0x6a4   :  { %v1842_v55 = vpop.eup %1841 }
 0x6a5   :  { %v1566_v17 = vmul.f32 %v1842_v55, %v1556_v34 }
 0x6a7   :  { %v1585_v6 = vrot.slane %v1566_v17, 7 }
 0x6a9   :  { %1603 = vmatmul.f32.vlgmr.msra.gmra.mxu2 %v1585_v6 }
 0x72c   :  { %v1604_v54 = vpop.f32.mrf.mxu2 }
 0x72d   :  { %v1605_v46 = vadd.f32 %v1604_v54, %v1583_v0 }
 0x72f   :  { %v1607_v23 = vmax.f32 %v1605_v46, 0.0 }
 0x731   :  { %1641 = vmatmul.f32.vlgmr.msra.gmra.mxu3 %v1607_v23 }
 0x7b4   :  { %v1642_v24 = vpop.f32.mrf.mxu3 }
 0x7b5   :  { %v1643_v61 = vadd.f32 %v1642_v24, %v1624_v3 }
 0x7b7   :  { %v1646_v43 = vsel %vm1645_vm3, %v1643_v61, -inf }
 0x7b8   :  { %1647 = vmax.xlane.f32.xlu0 %v1646_v43 }
 0x82b   :  { %v1648_v53 = vpop.xlane.xlu0 %1647 }
 0x82c   :  { %v1649_v8 = vsub.f32 %v1643_v61, %v1648_v53 }
 0x82e   :  { %v1650_v35 = vmul.f32 1.442695, %v1649_v8 }
 0x830   :  { %1843 = vpow2.f32 %v1650_v35 }
 0x836   :  { %v1844_v60 = vpop.eup %1843 }
 0x837   :  { %v1652_v30 = vsel %vm1645_vm3, %v1844_v60, 0.0 }
 0x838   :  { %1653 = vadd.xlane.f32.xlu1 %v1652_v30 }
 0x8ab   :  { %v1654_v18 = vpop.xlane.xlu1 %1653 }
 0x8ac   :  { %1845 = vlog2.f32 %v1654_v18 }
 0x8b2   :  { %v1846_v32 = vpop.eup %1845 }
 0x8b3   :  { %v1656_v57 = vmul.f32 0.6931472, %v1846_v32 }
 0x8b5   :  { %v1657_v44 = vsub.f32 %v1649_v8, %v1656_v57 }
 0x8b7   :  { %1658 = vst.msk [vmem:[#allocation7] sm:$0x1] %vm1645_vm3, %v1657_v44 }
 0x8b8   :  { %1669 = dma.vmem_to_hbm [thread:$0]  %s1665_s7, 16, %s1667_s21, [#allocation4]  }
 0x8b9   :  { %1987 = dma.done.wait [#allocation4], 16  }
 0x8ba   :  { %1988 = vsyncadd [#allocation4], 4294967280 }
 0x8bb   :  { %1674 = vsyncpa [#allocation3], 1 }
 0x8bc   :  { %1675 = vsyncpa [#allocation6], 1 }
 0x8bd   :  { %1676 = vsyncpa [#allocation4], 1 }

</bundles_post_ra>
